<compile_context>
chip_gen: v6e
topology: v6e:2x2x1
jax: 0.10.0
libtpu: 0.0.40
codegen_flags: <defaults>
</compile_context>

<pallas_src>
import jax
import jax.numpy as jnp
from jax.experimental import pallas as pl
from jax.experimental.pallas import tpu as pltpu

# --- small synthetic BERT config (bert-base-uncased scaled down) ---
VOCAB = 128
MAX_POS = 16
TYPE_VOCAB = 2
HIDDEN = 32
NUM_HEADS = 2
HEAD_DIM = HIDDEN // NUM_HEADS
INTERMEDIATE = 64
NUM_LAYERS = 2
NUM_LABELS = 2
LN_EPS = 1e-12
LOGITS_PAD = 128   # lane-dense classifier output; sliced to NUM_LABELS in wrapper


# ----------------------------- fused Pallas kernel --------------------------

def _bert_fused_kernel(x_ref, mask_ref,
                       wqkv_ref, bqkv_ref, wo_ref, bo_ref,
                       ln1g_ref, ln1b_ref,
                       w1_ref, b1_ref, w2_ref, b2_ref,
                       ln2g_ref, ln2b_ref,
                       embg_ref, embb_ref,
                       wp_ref, bp_ref, wc_ref, bc_ref,
                       o_ref):
    """One sequence per grid step: emb-LN -> encoder layers -> pooler -> classifier."""
    seq = x_ref.shape[0]
    f32 = jnp.float32
    bf16 = jnp.bfloat16

    def layernorm(y, g, b):
        mean = jnp.mean(y, axis=-1, keepdims=True)
        cen = y - mean
        var = jnp.mean(cen * cen, axis=-1, keepdims=True)
        return cen * jax.lax.rsqrt(var + LN_EPS) * g + b

    # Embedding LayerNorm (f32).
    x = layernorm(x_ref[...].astype(f32), embg_ref[...], embb_ref[...])     # (S, H)

    # Hoist the additive attention-mask broadcast once (f32, -1e9 on pads).
    mask = jnp.broadcast_to(mask_ref[...].reshape(1, 1, seq),
                            (NUM_HEADS, seq, seq))

    for l in range(NUM_LAYERS):                                   # static unroll
        # --- self-attention: fused QKV projection (one bf16 MXU matmul) ---
        qkv = jnp.dot(x.astype(bf16), wqkv_ref[l],
                      preferred_element_type=f32) + bqkv_ref[l]   # (S, 3H) f32
        # Heads stacked onto a leading batch axis -> one batched einsum pair.
        q = jnp.stack([qkv[:, h * HEAD_DIM:(h + 1) * HEAD_DIM]
                       for h in range(NUM_HEADS)], axis=0).astype(bf16)
        k = jnp.stack([qkv[:, HIDDEN + h * HEAD_DIM:HIDDEN + (h + 1) * HEAD_DIM]
                       for h in range(NUM_HEADS)], axis=0).astype(bf16)
        v = jnp.stack([qkv[:, 2 * HIDDEN + h * HEAD_DIM:2 * HIDDEN + (h + 1) * HEAD_DIM]
                       for h in range(NUM_HEADS)], axis=0).astype(bf16)

        # 1/sqrt(head_dim) already folded into the Q weights/bias.
        s = jnp.einsum('hqd,hkd->hqk', q, k,
                       preferred_element_type=f32) + mask          # (NH,S,S) f32
        s = s - jnp.max(s, axis=-1, keepdims=True)
        p = jnp.exp(s)
        # approx reciprocal (EUP slot): ~1e-3 rel. error vs exact softmax; OK for inference
        p = p * pl.reciprocal(jnp.sum(p, axis=-1, keepdims=True), approx=True)
        ctx = jnp.einsum('hqk,hkd->hqd', p.astype(bf16), v,
                         preferred_element_type=f32)               # (NH,S,Dh) f32
        # Fold heads back into the lane (hidden) dim.
        ctx = jnp.concatenate([ctx[h] for h in range(NUM_HEADS)], axis=-1)  # (S, H)

        attn_out = jnp.dot(ctx.astype(bf16), wo_ref[l],
                           preferred_element_type=f32) + bo_ref[l]
        # attention-output dropout is identity at inference
        x = layernorm(attn_out + x, ln1g_ref[l], ln1b_ref[l])

        # --- feed-forward block ---
        hmid = jnp.dot(x.astype(bf16), w1_ref[l],
                       preferred_element_type=f32) + b1_ref[l]
        # TODO(synk): HF bert-base uses exact erf-GELU; tanh approximation here.
        c = 0.7978845608028654  # sqrt(2/pi)
        hmid = 0.5 * hmid * (1.0 + jnp.tanh(c * (hmid + 0.044715 * hmid * hmid * hmid)))
        ffn = jnp.dot(hmid.astype(bf16), w2_ref[l],
                      preferred_element_type=f32) + b2_ref[l]
        # FFN-output dropout is identity at inference
        x = layernorm(ffn + x, ln2g_ref[l], ln2b_ref[l])

    # Pooler + classifier on all S rows (same MXU tiles as a single CLS row);
    # the wrapper keeps row 0 (= CLS token), columns [:NUM_LABELS].
    pooled = jnp.tanh(jnp.dot(x.astype(bf16), wp_ref[...],
                              preferred_element_type=f32) + bp_ref[...])    # (S, H)
    # self.dropout(pooled_output): nn.Dropout(p=0.3) is identity at inference.
    logits = jnp.dot(pooled.astype(bf16), wc_ref[...],
                     preferred_element_type=f32) + bc_ref[...]              # (S, 128)
    o_ref[...] = logits.astype(o_ref.dtype)                                 # lane-dense store


# ----------------------------- parameters ----------------------------------

def init_params(key):
    ks = iter(jax.random.split(key, 6 * NUM_LAYERS + 8))

    def w(shape):
        return jax.random.normal(next(ks), shape, jnp.float32) * 0.02

    scale = 1.0 / (HEAD_DIM ** 0.5)
    layer = {name: [] for name in
             ("wqkv", "bqkv", "wo", "bo", "ln1_g", "ln1_b",
              "w1", "b1", "w2", "b2", "ln2_g", "ln2_b")}
    for _ in range(NUM_LAYERS):
        wq, wk, wv = w((HIDDEN, HIDDEN)), w((HIDDEN, HIDDEN)), w((HIDDEN, HIDDEN))
        bq = jnp.zeros((HIDDEN,), jnp.float32)
        bk = jnp.zeros((HIDDEN,), jnp.float32)
        bv = jnp.zeros((HIDDEN,), jnp.float32)
        # fold 1/sqrt(head_dim) into the Q projection (weights AND bias)
        layer["wqkv"].append(jnp.concatenate([wq * scale, wk, wv], axis=1))
        layer["bqkv"].append(jnp.concatenate([bq * scale, bk, bv])[None, :])
        layer["wo"].append(w((HIDDEN, HIDDEN)))
        layer["bo"].append(jnp.zeros((1, HIDDEN), jnp.float32))
        layer["ln1_g"].append(jnp.ones((1, HIDDEN), jnp.float32))
        layer["ln1_b"].append(jnp.zeros((1, HIDDEN), jnp.float32))
        layer["w1"].append(w((HIDDEN, INTERMEDIATE)))
        layer["b1"].append(jnp.zeros((1, INTERMEDIATE), jnp.float32))
        layer["w2"].append(w((INTERMEDIATE, HIDDEN)))
        layer["b2"].append(jnp.zeros((1, HIDDEN), jnp.float32))
        layer["ln2_g"].append(jnp.ones((1, HIDDEN), jnp.float32))
        layer["ln2_b"].append(jnp.zeros((1, HIDDEN), jnp.float32))

    # classifier padded to 128 lane-dense output columns (first NUM_LABELS real)
    wc = jnp.zeros((HIDDEN, LOGITS_PAD), jnp.float32)
    wc = wc.at[:, :NUM_LABELS].set(w((HIDDEN, NUM_LABELS)))
    bc = jnp.zeros((1, LOGITS_PAD), jnp.float32)

    def stack_bf16(xs):
        return jnp.stack(xs, axis=0).astype(jnp.bfloat16)

    def stack_f32(xs):
        return jnp.stack(xs, axis=0)

    params = {
        # embedding tables (gathered in plain JAX outside the kernel)
        "word_emb": w((VOCAB, HIDDEN)),
        "pos_emb": w((MAX_POS, HIDDEN)),
        "type_emb": w((TYPE_VOCAB, HIDDEN)),
        "emb_ln_g": jnp.ones((1, HIDDEN), jnp.float32),
        "emb_ln_b": jnp.zeros((1, HIDDEN), jnp.float32),
        # bf16 MXU weights, f32 biases / LayerNorm params
        "wqkv": stack_bf16(layer["wqkv"]), "bqkv": stack_f32(layer["bqkv"]),
        "wo": stack_bf16(layer["wo"]),     "bo": stack_f32(layer["bo"]),
        "ln1_g": stack_f32(layer["ln1_g"]), "ln1_b": stack_f32(layer["ln1_b"]),
        "w1": stack_bf16(layer["w1"]),     "b1": stack_f32(layer["b1"]),
        "w2": stack_bf16(layer["w2"]),     "b2": stack_f32(layer["b2"]),
        "ln2_g": stack_f32(layer["ln2_g"]), "ln2_b": stack_f32(layer["ln2_b"]),
        "wp": w((HIDDEN, HIDDEN)).astype(jnp.bfloat16),
        "bp": jnp.zeros((1, HIDDEN), jnp.float32),
        "wc": wc.astype(jnp.bfloat16),
        "bc": bc,
    }
    return params


# ------------------------------ forward pass --------------------------------

@jax.jit
def bert_classifier_forward(params, input_ids, attention_mask):
    B, S = input_ids.shape

    # Embedding gathers are glue, done in plain JAX; everything else is fused.
    positions = jnp.arange(S, dtype=jnp.int32)
    token_type = jnp.zeros((B, S), dtype=jnp.int32)
    emb = (jnp.take(params["word_emb"], input_ids, axis=0)
           + jnp.take(params["pos_emb"], positions, axis=0)[None, :, :]
           + jnp.take(params["type_emb"], token_type, axis=0))          # (B, S, H) f32

    # HF extended attention mask: (1 - mask) * -1e9, shape (B, 1, S), f32.
    add_mask = ((1.0 - attention_mask.astype(jnp.float32)) * -1e9
                ).reshape(B, 1, S)

    weight_args = (params["wqkv"], params["bqkv"], params["wo"], params["bo"],
                   params["ln1_g"], params["ln1_b"],
                   params["w1"], params["b1"], params["w2"], params["b2"],
                   params["ln2_g"], params["ln2_b"],
                   params["emb_ln_g"], params["emb_ln_b"],
                   params["wp"], params["bp"], params["wc"], params["bc"])

    def resident(a):
        nd = a.ndim
        # same (full) block for every grid step -> stays resident in VMEM
        return pl.BlockSpec(tuple(a.shape), lambda b, _nd=nd: (0,) * _nd)

    out = pl.pallas_call(
        _bert_fused_kernel,
        out_shape=jax.ShapeDtypeStruct((B, S, LOGITS_PAD), jnp.float32),
        grid=(B,),
        in_specs=[pl.BlockSpec((None, S, HIDDEN), lambda b: (b, 0, 0)),
                  pl.BlockSpec((None, 1, S), lambda b: (b, 0, 0))]
                 + [resident(a) for a in weight_args],
        out_specs=pl.BlockSpec((None, S, LOGITS_PAD), lambda b: (b, 0, 0)),
        compiler_params=pltpu.CompilerParams(
            dimension_semantics=("parallel",)),
    )(emb, add_mask, *weight_args)

    # CLS row, real logit columns.
    return out[:, 0, :NUM_LABELS]


if __name__ == "__main__":
    key = jax.random.PRNGKey(0)
    pkey, dkey = jax.random.split(key)
    params = init_params(pkey)

    B, S = 2, 8
    input_ids = jax.random.randint(dkey, (B, S), 0, VOCAB, dtype=jnp.int32)
    attention_mask = jnp.array(
        [[1, 1, 1, 1, 1, 1, 1, 1],
         [1, 1, 1, 1, 1, 0, 0, 0]], dtype=jnp.int32)

    logits = bert_classifier_forward(params, input_ids, attention_mask)
    jax.block_until_ready(logits)
    assert logits.shape == (B, NUM_LABELS), logits.shape
    assert bool(jnp.all(jnp.isfinite(logits)))
    print("KERNEL_OK")
</pallas_src>

<mosaic_0001>
module attributes {stable_mosaic.version = 11 : i64} {
  func.func @_bert_fused_kernel(%arg0: i32, %arg1: memref<1x8x32xf32, #tpu.memory_space<vmem>>, %arg2: memref<1x1x8xf32, #tpu.memory_space<vmem>>, %arg3: memref<2x32x96xbf16, #tpu.memory_space<vmem>>, %arg4: memref<2x1x96xf32, #tpu.memory_space<vmem>>, %arg5: memref<2x32x32xbf16, #tpu.memory_space<vmem>>, %arg6: memref<2x1x32xf32, #tpu.memory_space<vmem>>, %arg7: memref<2x1x32xf32, #tpu.memory_space<vmem>>, %arg8: memref<2x1x32xf32, #tpu.memory_space<vmem>>, %arg9: memref<2x32x64xbf16, #tpu.memory_space<vmem>>, %arg10: memref<2x1x64xf32, #tpu.memory_space<vmem>>, %arg11: memref<2x64x32xbf16, #tpu.memory_space<vmem>>, %arg12: memref<2x1x32xf32, #tpu.memory_space<vmem>>, %arg13: memref<2x1x32xf32, #tpu.memory_space<vmem>>, %arg14: memref<2x1x32xf32, #tpu.memory_space<vmem>>, %arg15: memref<1x32xf32, #tpu.memory_space<vmem>>, %arg16: memref<1x32xf32, #tpu.memory_space<vmem>>, %arg17: memref<32x32xbf16, #tpu.memory_space<vmem>>, %arg18: memref<1x32xf32, #tpu.memory_space<vmem>>, %arg19: memref<32x128xbf16, #tpu.memory_space<vmem>>, %arg20: memref<1x128xf32, #tpu.memory_space<vmem>>, %arg21: memref<1x8x128xf32, #tpu.memory_space<vmem>>) attributes {dimension_semantics = [#tpu.dimension_semantics<parallel>], iteration_bounds = array<i64: 2>, scalar_prefetch = 0 : i64, scratch_operands = 0 : i64, tpu.core_type = #tpu.core_type<tc>, window_params = [{transform_indices = @transform_0, window_bounds = array<i64: 1, 8, 32>}, {transform_indices = @transform_1, window_bounds = array<i64: 1, 1, 8>}, {pipeline_mode = #tpu.pipeline_mode<synchronous>, transform_indices = @transform_2, window_bounds = array<i64: 2, 32, 96>}, {pipeline_mode = #tpu.pipeline_mode<synchronous>, transform_indices = @transform_3, window_bounds = array<i64: 2, 1, 96>}, {pipeline_mode = #tpu.pipeline_mode<synchronous>, transform_indices = @transform_4, window_bounds = array<i64: 2, 32, 32>}, {pipeline_mode = #tpu.pipeline_mode<synchronous>, transform_indices = @transform_5, window_bounds = array<i64: 2, 1, 32>}, {pipeline_mode = #tpu.pipeline_mode<synchronous>, transform_indices = @transform_6, window_bounds = array<i64: 2, 1, 32>}, {pipeline_mode = #tpu.pipeline_mode<synchronous>, transform_indices = @transform_7, window_bounds = array<i64: 2, 1, 32>}, {pipeline_mode = #tpu.pipeline_mode<synchronous>, transform_indices = @transform_8, window_bounds = array<i64: 2, 32, 64>}, {pipeline_mode = #tpu.pipeline_mode<synchronous>, transform_indices = @transform_9, window_bounds = array<i64: 2, 1, 64>}, {pipeline_mode = #tpu.pipeline_mode<synchronous>, transform_indices = @transform_10, window_bounds = array<i64: 2, 64, 32>}, {pipeline_mode = #tpu.pipeline_mode<synchronous>, transform_indices = @transform_11, window_bounds = array<i64: 2, 1, 32>}, {pipeline_mode = #tpu.pipeline_mode<synchronous>, transform_indices = @transform_12, window_bounds = array<i64: 2, 1, 32>}, {pipeline_mode = #tpu.pipeline_mode<synchronous>, transform_indices = @transform_13, window_bounds = array<i64: 2, 1, 32>}, {pipeline_mode = #tpu.pipeline_mode<synchronous>, transform_indices = @transform_14, window_bounds = array<i64: 1, 32>}, {pipeline_mode = #tpu.pipeline_mode<synchronous>, transform_indices = @transform_15, window_bounds = array<i64: 1, 32>}, {pipeline_mode = #tpu.pipeline_mode<synchronous>, transform_indices = @transform_16, window_bounds = array<i64: 32, 32>}, {pipeline_mode = #tpu.pipeline_mode<synchronous>, transform_indices = @transform_17, window_bounds = array<i64: 1, 32>}, {pipeline_mode = #tpu.pipeline_mode<synchronous>, transform_indices = @transform_18, window_bounds = array<i64: 32, 128>}, {pipeline_mode = #tpu.pipeline_mode<synchronous>, transform_indices = @transform_19, window_bounds = array<i64: 1, 128>}, {transform_indices = @transform_20, window_bounds = array<i64: 1, 8, 128>}]} {
    %c0 = arith.constant 0 : index
    %c0_0 = arith.constant 0 : index
    %c0_1 = arith.constant 0 : index
    %0 = vector.load %arg1[%c0, %c0_0, %c0_1] : memref<1x8x32xf32, #tpu.memory_space<vmem>>, vector<1x8x32xf32>
    %1 = vector.shape_cast %0 : vector<1x8x32xf32> to vector<8x32xf32>
    %c0_2 = arith.constant 0 : index
    %c0_3 = arith.constant 0 : index
    %2 = vector.load %arg15[%c0_2, %c0_3] : memref<1x32xf32, #tpu.memory_space<vmem>>, vector<1x32xf32>
    %c0_4 = arith.constant 0 : index
    %c0_5 = arith.constant 0 : index
    %3 = vector.load %arg16[%c0_4, %c0_5] : memref<1x32xf32, #tpu.memory_space<vmem>>, vector<1x32xf32>
    %cst = arith.constant dense<0.000000e+00> : vector<8xf32>
    %4 = vector.multi_reduction <add>, %1, %cst [1] : vector<8x32xf32> to vector<8xf32>
    %5 = vector.shape_cast %4 : vector<8xf32> to vector<8x1xf32>
    %cst_6 = arith.constant 3.200000e+01 : f32
    %6 = vector.broadcast %cst_6 : f32 to vector<8x1xf32>
    %7 = arith.divf %5, %6 : vector<8x1xf32>
    %8 = vector.broadcast %7 : vector<8x1xf32> to vector<8x32xf32>
    %9 = arith.subf %1, %8 : vector<8x32xf32>
    %10 = arith.mulf %9, %9 : vector<8x32xf32>
    %cst_7 = arith.constant dense<0.000000e+00> : vector<8xf32>
    %11 = vector.multi_reduction <add>, %10, %cst_7 [1] : vector<8x32xf32> to vector<8xf32>
    %12 = vector.shape_cast %11 : vector<8xf32> to vector<8x1xf32>
    %cst_8 = arith.constant 3.200000e+01 : f32
    %13 = vector.broadcast %cst_8 : f32 to vector<8x1xf32>
    %14 = arith.divf %12, %13 : vector<8x1xf32>
    %cst_9 = arith.constant 9.99999996E-13 : f32
    %15 = vector.broadcast %cst_9 : f32 to vector<8x1xf32>
    %16 = arith.addf %14, %15 : vector<8x1xf32>
    %17 = math.rsqrt %16 : vector<8x1xf32>
    %18 = vector.broadcast %17 : vector<8x1xf32> to vector<8x32xf32>
    %19 = arith.mulf %9, %18 : vector<8x32xf32>
    %20 = vector.broadcast %2 : vector<1x32xf32> to vector<8x32xf32>
    %21 = arith.mulf %19, %20 : vector<8x32xf32>
    %22 = vector.broadcast %3 : vector<1x32xf32> to vector<8x32xf32>
    %23 = arith.addf %21, %22 : vector<8x32xf32>
    %c0_10 = arith.constant 0 : index
    %c0_11 = arith.constant 0 : index
    %c0_12 = arith.constant 0 : index
    %24 = vector.load %arg2[%c0_10, %c0_11, %c0_12] : memref<1x1x8xf32, #tpu.memory_space<vmem>>, vector<1x1x8xf32>
    %25 = vector.shape_cast %24 : vector<1x1x8xf32> to vector<1x8xf32>
    %26 = vector.shape_cast %25 : vector<1x8xf32> to vector<1x1x8xf32>
    %27 = vector.shape_cast %26 : vector<1x1x8xf32> to vector<1x1x8xf32>
    %28 = vector.broadcast %27 : vector<1x1x8xf32> to vector<2x8x8xf32>
    %29 = arith.truncf %23 : vector<8x32xf32> to vector<8x32xbf16>
    %c0_13 = arith.constant 0 : index
    %c0_14 = arith.constant 0 : index
    %c0_15 = arith.constant 0 : index
    %30 = vector.load %arg3[%c0_13, %c0_14, %c0_15] : memref<2x32x96xbf16, #tpu.memory_space<vmem>>, vector<1x32x96xbf16>
    %31 = vector.shape_cast %30 : vector<1x32x96xbf16> to vector<32x96xbf16>
    %cst_16 = arith.constant dense<0.000000e+00> : vector<8x96xf32>
    %32 = tpu.matmul %29, %31, %cst_16 {dimension_numbers = #tpu.dot_dimension_numbers<[1], [0], [0], [1], [0, 0, 1, 1], [], []>} : vector<8x32xbf16>, vector<32x96xbf16>, vector<8x96xf32> -> vector<8x96xf32>
    %c0_17 = arith.constant 0 : index
    %c0_18 = arith.constant 0 : index
    %c0_19 = arith.constant 0 : index
    %33 = vector.load %arg4[%c0_17, %c0_18, %c0_19] : memref<2x1x96xf32, #tpu.memory_space<vmem>>, vector<1x1x96xf32>
    %34 = vector.shape_cast %33 : vector<1x1x96xf32> to vector<1x96xf32>
    %35 = vector.broadcast %34 : vector<1x96xf32> to vector<8x96xf32>
    %36 = arith.addf %32, %35 : vector<8x96xf32>
    %37 = vector.extract_strided_slice %36 {offsets = [0, 0], sizes = [8, 16], strides = [1, 1]} : vector<8x96xf32> to vector<8x16xf32>
    %38 = vector.extract_strided_slice %36 {offsets = [0, 16], sizes = [8, 16], strides = [1, 1]} : vector<8x96xf32> to vector<8x16xf32>
    %39 = vector.shape_cast %37 : vector<8x16xf32> to vector<1x8x16xf32>
    %40 = vector.shape_cast %38 : vector<8x16xf32> to vector<1x8x16xf32>
    %41 = tpu.concatenate %39, %40 in 0 : vector<1x8x16xf32>, vector<1x8x16xf32> -> vector<2x8x16xf32>
    %42 = arith.truncf %41 : vector<2x8x16xf32> to vector<2x8x16xbf16>
    %43 = vector.extract_strided_slice %36 {offsets = [0, 32], sizes = [8, 16], strides = [1, 1]} : vector<8x96xf32> to vector<8x16xf32>
    %44 = vector.extract_strided_slice %36 {offsets = [0, 48], sizes = [8, 16], strides = [1, 1]} : vector<8x96xf32> to vector<8x16xf32>
    %45 = vector.shape_cast %43 : vector<8x16xf32> to vector<1x8x16xf32>
    %46 = vector.shape_cast %44 : vector<8x16xf32> to vector<1x8x16xf32>
    %47 = tpu.concatenate %45, %46 in 0 : vector<1x8x16xf32>, vector<1x8x16xf32> -> vector<2x8x16xf32>
    %48 = arith.truncf %47 : vector<2x8x16xf32> to vector<2x8x16xbf16>
    %49 = vector.extract_strided_slice %36 {offsets = [0, 64], sizes = [8, 16], strides = [1, 1]} : vector<8x96xf32> to vector<8x16xf32>
    %50 = vector.extract_strided_slice %36 {offsets = [0, 80], sizes = [8, 16], strides = [1, 1]} : vector<8x96xf32> to vector<8x16xf32>
    %51 = vector.shape_cast %49 : vector<8x16xf32> to vector<1x8x16xf32>
    %52 = vector.shape_cast %50 : vector<8x16xf32> to vector<1x8x16xf32>
    %53 = tpu.concatenate %51, %52 in 0 : vector<1x8x16xf32>, vector<1x8x16xf32> -> vector<2x8x16xf32>
    %54 = arith.truncf %53 : vector<2x8x16xf32> to vector<2x8x16xbf16>
    "tpu.trace_start"() <{level = 10 : i32, message = "hqd,hkd->hqk"}> : () -> ()
    %cst_20 = arith.constant dense<0.000000e+00> : vector<2x8x8xf32>
    %55 = tpu.matmul %42, %48, %cst_20 {dimension_numbers = #tpu.dot_dimension_numbers<[2], [2], [1], [1], [0, 0, 0, 1, 1, 1], [0], [0]>} : vector<2x8x16xbf16>, vector<2x8x16xbf16>, vector<2x8x8xf32> -> vector<2x8x8xf32>
    "tpu.trace_stop"() : () -> ()
    %56 = arith.addf %55, %28 : vector<2x8x8xf32>
    %cst_21 = arith.constant dense<0xFF800000> : vector<2x8xf32>
    %57 = vector.multi_reduction <maximumf>, %56, %cst_21 [2] : vector<2x8x8xf32> to vector<2x8xf32>
    %58 = vector.shape_cast %57 : vector<2x8xf32> to vector<2x8x1xf32>
    %59 = vector.broadcast %58 : vector<2x8x1xf32> to vector<2x8x8xf32>
    %60 = arith.subf %56, %59 : vector<2x8x8xf32>
    %61 = math.exp %60 : vector<2x8x8xf32>
    %cst_22 = arith.constant dense<0.000000e+00> : vector<2x8xf32>
    %62 = vector.multi_reduction <add>, %61, %cst_22 [2] : vector<2x8x8xf32> to vector<2x8xf32>
    %63 = vector.shape_cast %62 : vector<2x8xf32> to vector<2x8x1xf32>
    %64 = tpu.reciprocal %63 {approx = true} : vector<2x8x1xf32> -> vector<2x8x1xf32>
    %65 = vector.broadcast %64 : vector<2x8x1xf32> to vector<2x8x8xf32>
    %66 = arith.mulf %61, %65 : vector<2x8x8xf32>
    %67 = arith.truncf %66 : vector<2x8x8xf32> to vector<2x8x8xbf16>
    "tpu.trace_start"() <{level = 10 : i32, message = "hqk,hkd->hqd"}> : () -> ()
    %cst_23 = arith.constant dense<0.000000e+00> : vector<2x8x16xf32>
    %68 = tpu.matmul %67, %54, %cst_23 {dimension_numbers = #tpu.dot_dimension_numbers<[2], [1], [1], [2], [0, 0, 0, 1, 1, 2], [0], [0]>} : vector<2x8x8xbf16>, vector<2x8x16xbf16>, vector<2x8x16xf32> -> vector<2x8x16xf32>
    "tpu.trace_stop"() : () -> ()
    %69 = vector.extract_strided_slice %68 {offsets = [0, 0, 0], sizes = [1, 8, 16], strides = [1, 1, 1]} : vector<2x8x16xf32> to vector<1x8x16xf32>
    %70 = vector.shape_cast %69 : vector<1x8x16xf32> to vector<8x16xf32>
    %71 = vector.extract_strided_slice %68 {offsets = [1, 0, 0], sizes = [1, 8, 16], strides = [1, 1, 1]} : vector<2x8x16xf32> to vector<1x8x16xf32>
    %72 = vector.shape_cast %71 : vector<1x8x16xf32> to vector<8x16xf32>
    %73 = tpu.concatenate %70, %72 in 1 : vector<8x16xf32>, vector<8x16xf32> -> vector<8x32xf32>
    %74 = arith.truncf %73 : vector<8x32xf32> to vector<8x32xbf16>
    %c0_24 = arith.constant 0 : index
    %c0_25 = arith.constant 0 : index
    %c0_26 = arith.constant 0 : index
    %75 = vector.load %arg5[%c0_24, %c0_25, %c0_26] : memref<2x32x32xbf16, #tpu.memory_space<vmem>>, vector<1x32x32xbf16>
    %76 = vector.shape_cast %75 : vector<1x32x32xbf16> to vector<32x32xbf16>
    %cst_27 = arith.constant dense<0.000000e+00> : vector<8x32xf32>
    %77 = tpu.matmul %74, %76, %cst_27 {dimension_numbers = #tpu.dot_dimension_numbers<[1], [0], [0], [1], [0, 0, 1, 1], [], []>} : vector<8x32xbf16>, vector<32x32xbf16>, vector<8x32xf32> -> vector<8x32xf32>
    %c0_28 = arith.constant 0 : index
    %c0_29 = arith.constant 0 : index
    %c0_30 = arith.constant 0 : index
    %78 = vector.load %arg6[%c0_28, %c0_29, %c0_30] : memref<2x1x32xf32, #tpu.memory_space<vmem>>, vector<1x1x32xf32>
    %79 = vector.shape_cast %78 : vector<1x1x32xf32> to vector<1x32xf32>
    %80 = vector.broadcast %79 : vector<1x32xf32> to vector<8x32xf32>
    %81 = arith.addf %77, %80 : vector<8x32xf32>
    %82 = arith.addf %81, %23 : vector<8x32xf32>
    %c0_31 = arith.constant 0 : index
    %c0_32 = arith.constant 0 : index
    %c0_33 = arith.constant 0 : index
    %83 = vector.load %arg7[%c0_31, %c0_32, %c0_33] : memref<2x1x32xf32, #tpu.memory_space<vmem>>, vector<1x1x32xf32>
    %84 = vector.shape_cast %83 : vector<1x1x32xf32> to vector<1x32xf32>
    %c0_34 = arith.constant 0 : index
    %c0_35 = arith.constant 0 : index
    %c0_36 = arith.constant 0 : index
    %85 = vector.load %arg8[%c0_34, %c0_35, %c0_36] : memref<2x1x32xf32, #tpu.memory_space<vmem>>, vector<1x1x32xf32>
    %86 = vector.shape_cast %85 : vector<1x1x32xf32> to vector<1x32xf32>
    %cst_37 = arith.constant dense<0.000000e+00> : vector<8xf32>
    %87 = vector.multi_reduction <add>, %82, %cst_37 [1] : vector<8x32xf32> to vector<8xf32>
    %88 = vector.shape_cast %87 : vector<8xf32> to vector<8x1xf32>
    %cst_38 = arith.constant 3.200000e+01 : f32
    %89 = vector.broadcast %cst_38 : f32 to vector<8x1xf32>
    %90 = arith.divf %88, %89 : vector<8x1xf32>
    %91 = vector.broadcast %90 : vector<8x1xf32> to vector<8x32xf32>
    %92 = arith.subf %82, %91 : vector<8x32xf32>
    %93 = arith.mulf %92, %92 : vector<8x32xf32>
    %cst_39 = arith.constant dense<0.000000e+00> : vector<8xf32>
    %94 = vector.multi_reduction <add>, %93, %cst_39 [1] : vector<8x32xf32> to vector<8xf32>
    %95 = vector.shape_cast %94 : vector<8xf32> to vector<8x1xf32>
    %cst_40 = arith.constant 3.200000e+01 : f32
    %96 = vector.broadcast %cst_40 : f32 to vector<8x1xf32>
    %97 = arith.divf %95, %96 : vector<8x1xf32>
    %cst_41 = arith.constant 9.99999996E-13 : f32
    %98 = vector.broadcast %cst_41 : f32 to vector<8x1xf32>
    %99 = arith.addf %97, %98 : vector<8x1xf32>
    %100 = math.rsqrt %99 : vector<8x1xf32>
    %101 = vector.broadcast %100 : vector<8x1xf32> to vector<8x32xf32>
    %102 = arith.mulf %92, %101 : vector<8x32xf32>
    %103 = vector.broadcast %84 : vector<1x32xf32> to vector<8x32xf32>
    %104 = arith.mulf %102, %103 : vector<8x32xf32>
    %105 = vector.broadcast %86 : vector<1x32xf32> to vector<8x32xf32>
    %106 = arith.addf %104, %105 : vector<8x32xf32>
    %107 = arith.truncf %106 : vector<8x32xf32> to vector<8x32xbf16>
    %c0_42 = arith.constant 0 : index
    %c0_43 = arith.constant 0 : index
    %c0_44 = arith.constant 0 : index
    %108 = vector.load %arg9[%c0_42, %c0_43, %c0_44] : memref<2x32x64xbf16, #tpu.memory_space<vmem>>, vector<1x32x64xbf16>
    %109 = vector.shape_cast %108 : vector<1x32x64xbf16> to vector<32x64xbf16>
    %cst_45 = arith.constant dense<0.000000e+00> : vector<8x64xf32>
    %110 = tpu.matmul %107, %109, %cst_45 {dimension_numbers = #tpu.dot_dimension_numbers<[1], [0], [0], [1], [0, 0, 1, 1], [], []>} : vector<8x32xbf16>, vector<32x64xbf16>, vector<8x64xf32> -> vector<8x64xf32>
    %c0_46 = arith.constant 0 : index
    %c0_47 = arith.constant 0 : index
    %c0_48 = arith.constant 0 : index
    %111 = vector.load %arg10[%c0_46, %c0_47, %c0_48] : memref<2x1x64xf32, #tpu.memory_space<vmem>>, vector<1x1x64xf32>
    %112 = vector.shape_cast %111 : vector<1x1x64xf32> to vector<1x64xf32>
    %113 = vector.broadcast %112 : vector<1x64xf32> to vector<8x64xf32>
    %114 = arith.addf %110, %113 : vector<8x64xf32>
    %cst_49 = arith.constant 5.000000e-01 : f32
    %115 = vector.broadcast %cst_49 : f32 to vector<8x64xf32>
    %116 = arith.mulf %115, %114 : vector<8x64xf32>
    %cst_50 = arith.constant 4.471500e-02 : f32
    %117 = vector.broadcast %cst_50 : f32 to vector<8x64xf32>
    %118 = arith.mulf %117, %114 : vector<8x64xf32>
    %119 = arith.mulf %118, %114 : vector<8x64xf32>
    %120 = arith.mulf %119, %114 : vector<8x64xf32>
    %121 = arith.addf %114, %120 : vector<8x64xf32>
    %cst_51 = arith.constant 0.797884583 : f32
    %122 = vector.broadcast %cst_51 : f32 to vector<8x64xf32>
    %123 = arith.mulf %122, %121 : vector<8x64xf32>
    %124 = math.tanh %123 : vector<8x64xf32>
    %cst_52 = arith.constant 1.000000e+00 : f32
    %125 = vector.broadcast %cst_52 : f32 to vector<8x64xf32>
    %126 = arith.addf %125, %124 : vector<8x64xf32>
    %127 = arith.mulf %116, %126 : vector<8x64xf32>
    %128 = arith.truncf %127 : vector<8x64xf32> to vector<8x64xbf16>
    %c0_53 = arith.constant 0 : index
    %c0_54 = arith.constant 0 : index
    %c0_55 = arith.constant 0 : index
    %129 = vector.load %arg11[%c0_53, %c0_54, %c0_55] : memref<2x64x32xbf16, #tpu.memory_space<vmem>>, vector<1x64x32xbf16>
    %130 = vector.shape_cast %129 : vector<1x64x32xbf16> to vector<64x32xbf16>
    %cst_56 = arith.constant dense<0.000000e+00> : vector<8x32xf32>
    %131 = tpu.matmul %128, %130, %cst_56 {dimension_numbers = #tpu.dot_dimension_numbers<[1], [0], [0], [1], [0, 0, 1, 1], [], []>} : vector<8x64xbf16>, vector<64x32xbf16>, vector<8x32xf32> -> vector<8x32xf32>
    %c0_57 = arith.constant 0 : index
    %c0_58 = arith.constant 0 : index
    %c0_59 = arith.constant 0 : index
    %132 = vector.load %arg12[%c0_57, %c0_58, %c0_59] : memref<2x1x32xf32, #tpu.memory_space<vmem>>, vector<1x1x32xf32>
    %133 = vector.shape_cast %132 : vector<1x1x32xf32> to vector<1x32xf32>
    %134 = vector.broadcast %133 : vector<1x32xf32> to vector<8x32xf32>
    %135 = arith.addf %131, %134 : vector<8x32xf32>
    %136 = arith.addf %135, %106 : vector<8x32xf32>
    %c0_60 = arith.constant 0 : index
    %c0_61 = arith.constant 0 : index
    %c0_62 = arith.constant 0 : index
    %137 = vector.load %arg13[%c0_60, %c0_61, %c0_62] : memref<2x1x32xf32, #tpu.memory_space<vmem>>, vector<1x1x32xf32>
    %138 = vector.shape_cast %137 : vector<1x1x32xf32> to vector<1x32xf32>
    %c0_63 = arith.constant 0 : index
    %c0_64 = arith.constant 0 : index
    %c0_65 = arith.constant 0 : index
    %139 = vector.load %arg14[%c0_63, %c0_64, %c0_65] : memref<2x1x32xf32, #tpu.memory_space<vmem>>, vector<1x1x32xf32>
    %140 = vector.shape_cast %139 : vector<1x1x32xf32> to vector<1x32xf32>
    %cst_66 = arith.constant dense<0.000000e+00> : vector<8xf32>
    %141 = vector.multi_reduction <add>, %136, %cst_66 [1] : vector<8x32xf32> to vector<8xf32>
    %142 = vector.shape_cast %141 : vector<8xf32> to vector<8x1xf32>
    %cst_67 = arith.constant 3.200000e+01 : f32
    %143 = vector.broadcast %cst_67 : f32 to vector<8x1xf32>
    %144 = arith.divf %142, %143 : vector<8x1xf32>
    %145 = vector.broadcast %144 : vector<8x1xf32> to vector<8x32xf32>
    %146 = arith.subf %136, %145 : vector<8x32xf32>
    %147 = arith.mulf %146, %146 : vector<8x32xf32>
    %cst_68 = arith.constant dense<0.000000e+00> : vector<8xf32>
    %148 = vector.multi_reduction <add>, %147, %cst_68 [1] : vector<8x32xf32> to vector<8xf32>
    %149 = vector.shape_cast %148 : vector<8xf32> to vector<8x1xf32>
    %cst_69 = arith.constant 3.200000e+01 : f32
    %150 = vector.broadcast %cst_69 : f32 to vector<8x1xf32>
    %151 = arith.divf %149, %150 : vector<8x1xf32>
    %cst_70 = arith.constant 9.99999996E-13 : f32
    %152 = vector.broadcast %cst_70 : f32 to vector<8x1xf32>
    %153 = arith.addf %151, %152 : vector<8x1xf32>
    %154 = math.rsqrt %153 : vector<8x1xf32>
    %155 = vector.broadcast %154 : vector<8x1xf32> to vector<8x32xf32>
    %156 = arith.mulf %146, %155 : vector<8x32xf32>
    %157 = vector.broadcast %138 : vector<1x32xf32> to vector<8x32xf32>
    %158 = arith.mulf %156, %157 : vector<8x32xf32>
    %159 = vector.broadcast %140 : vector<1x32xf32> to vector<8x32xf32>
    %160 = arith.addf %158, %159 : vector<8x32xf32>
    %161 = arith.truncf %160 : vector<8x32xf32> to vector<8x32xbf16>
    %c1 = arith.constant 1 : index
    %c0_71 = arith.constant 0 : index
    %c0_72 = arith.constant 0 : index
    %162 = vector.load %arg3[%c1, %c0_71, %c0_72] : memref<2x32x96xbf16, #tpu.memory_space<vmem>>, vector<1x32x96xbf16>
    %163 = vector.shape_cast %162 : vector<1x32x96xbf16> to vector<32x96xbf16>
    %cst_73 = arith.constant dense<0.000000e+00> : vector<8x96xf32>
    %164 = tpu.matmul %161, %163, %cst_73 {dimension_numbers = #tpu.dot_dimension_numbers<[1], [0], [0], [1], [0, 0, 1, 1], [], []>} : vector<8x32xbf16>, vector<32x96xbf16>, vector<8x96xf32> -> vector<8x96xf32>
    %c1_74 = arith.constant 1 : index
    %c0_75 = arith.constant 0 : index
    %c0_76 = arith.constant 0 : index
    %165 = vector.load %arg4[%c1_74, %c0_75, %c0_76] : memref<2x1x96xf32, #tpu.memory_space<vmem>>, vector<1x1x96xf32>
    %166 = vector.shape_cast %165 : vector<1x1x96xf32> to vector<1x96xf32>
    %167 = vector.broadcast %166 : vector<1x96xf32> to vector<8x96xf32>
    %168 = arith.addf %164, %167 : vector<8x96xf32>
    %169 = vector.extract_strided_slice %168 {offsets = [0, 0], sizes = [8, 16], strides = [1, 1]} : vector<8x96xf32> to vector<8x16xf32>
    %170 = vector.extract_strided_slice %168 {offsets = [0, 16], sizes = [8, 16], strides = [1, 1]} : vector<8x96xf32> to vector<8x16xf32>
    %171 = vector.shape_cast %169 : vector<8x16xf32> to vector<1x8x16xf32>
    %172 = vector.shape_cast %170 : vector<8x16xf32> to vector<1x8x16xf32>
    %173 = tpu.concatenate %171, %172 in 0 : vector<1x8x16xf32>, vector<1x8x16xf32> -> vector<2x8x16xf32>
    %174 = arith.truncf %173 : vector<2x8x16xf32> to vector<2x8x16xbf16>
    %175 = vector.extract_strided_slice %168 {offsets = [0, 32], sizes = [8, 16], strides = [1, 1]} : vector<8x96xf32> to vector<8x16xf32>
    %176 = vector.extract_strided_slice %168 {offsets = [0, 48], sizes = [8, 16], strides = [1, 1]} : vector<8x96xf32> to vector<8x16xf32>
    %177 = vector.shape_cast %175 : vector<8x16xf32> to vector<1x8x16xf32>
    %178 = vector.shape_cast %176 : vector<8x16xf32> to vector<1x8x16xf32>
    %179 = tpu.concatenate %177, %178 in 0 : vector<1x8x16xf32>, vector<1x8x16xf32> -> vector<2x8x16xf32>
    %180 = arith.truncf %179 : vector<2x8x16xf32> to vector<2x8x16xbf16>
    %181 = vector.extract_strided_slice %168 {offsets = [0, 64], sizes = [8, 16], strides = [1, 1]} : vector<8x96xf32> to vector<8x16xf32>
    %182 = vector.extract_strided_slice %168 {offsets = [0, 80], sizes = [8, 16], strides = [1, 1]} : vector<8x96xf32> to vector<8x16xf32>
    %183 = vector.shape_cast %181 : vector<8x16xf32> to vector<1x8x16xf32>
    %184 = vector.shape_cast %182 : vector<8x16xf32> to vector<1x8x16xf32>
    %185 = tpu.concatenate %183, %184 in 0 : vector<1x8x16xf32>, vector<1x8x16xf32> -> vector<2x8x16xf32>
    %186 = arith.truncf %185 : vector<2x8x16xf32> to vector<2x8x16xbf16>
    "tpu.trace_start"() <{level = 10 : i32, message = "hqd,hkd->hqk"}> : () -> ()
    %cst_77 = arith.constant dense<0.000000e+00> : vector<2x8x8xf32>
    %187 = tpu.matmul %174, %180, %cst_77 {dimension_numbers = #tpu.dot_dimension_numbers<[2], [2], [1], [1], [0, 0, 0, 1, 1, 1], [0], [0]>} : vector<2x8x16xbf16>, vector<2x8x16xbf16>, vector<2x8x8xf32> -> vector<2x8x8xf32>
    "tpu.trace_stop"() : () -> ()
    %188 = arith.addf %187, %28 : vector<2x8x8xf32>
    %cst_78 = arith.constant dense<0xFF800000> : vector<2x8xf32>
    %189 = vector.multi_reduction <maximumf>, %188, %cst_78 [2] : vector<2x8x8xf32> to vector<2x8xf32>
    %190 = vector.shape_cast %189 : vector<2x8xf32> to vector<2x8x1xf32>
    %191 = vector.broadcast %190 : vector<2x8x1xf32> to vector<2x8x8xf32>
    %192 = arith.subf %188, %191 : vector<2x8x8xf32>
    %193 = math.exp %192 : vector<2x8x8xf32>
    %cst_79 = arith.constant dense<0.000000e+00> : vector<2x8xf32>
    %194 = vector.multi_reduction <add>, %193, %cst_79 [2] : vector<2x8x8xf32> to vector<2x8xf32>
    %195 = vector.shape_cast %194 : vector<2x8xf32> to vector<2x8x1xf32>
    %196 = tpu.reciprocal %195 {approx = true} : vector<2x8x1xf32> -> vector<2x8x1xf32>
    %197 = vector.broadcast %196 : vector<2x8x1xf32> to vector<2x8x8xf32>
    %198 = arith.mulf %193, %197 : vector<2x8x8xf32>
    %199 = arith.truncf %198 : vector<2x8x8xf32> to vector<2x8x8xbf16>
    "tpu.trace_start"() <{level = 10 : i32, message = "hqk,hkd->hqd"}> : () -> ()
    %cst_80 = arith.constant dense<0.000000e+00> : vector<2x8x16xf32>
    %200 = tpu.matmul %199, %186, %cst_80 {dimension_numbers = #tpu.dot_dimension_numbers<[2], [1], [1], [2], [0, 0, 0, 1, 1, 2], [0], [0]>} : vector<2x8x8xbf16>, vector<2x8x16xbf16>, vector<2x8x16xf32> -> vector<2x8x16xf32>
    "tpu.trace_stop"() : () -> ()
    %201 = vector.extract_strided_slice %200 {offsets = [0, 0, 0], sizes = [1, 8, 16], strides = [1, 1, 1]} : vector<2x8x16xf32> to vector<1x8x16xf32>
    %202 = vector.shape_cast %201 : vector<1x8x16xf32> to vector<8x16xf32>
    %203 = vector.extract_strided_slice %200 {offsets = [1, 0, 0], sizes = [1, 8, 16], strides = [1, 1, 1]} : vector<2x8x16xf32> to vector<1x8x16xf32>
    %204 = vector.shape_cast %203 : vector<1x8x16xf32> to vector<8x16xf32>
    %205 = tpu.concatenate %202, %204 in 1 : vector<8x16xf32>, vector<8x16xf32> -> vector<8x32xf32>
    %206 = arith.truncf %205 : vector<8x32xf32> to vector<8x32xbf16>
    %c1_81 = arith.constant 1 : index
    %c0_82 = arith.constant 0 : index
    %c0_83 = arith.constant 0 : index
    %207 = vector.load %arg5[%c1_81, %c0_82, %c0_83] : memref<2x32x32xbf16, #tpu.memory_space<vmem>>, vector<1x32x32xbf16>
    %208 = vector.shape_cast %207 : vector<1x32x32xbf16> to vector<32x32xbf16>
    %cst_84 = arith.constant dense<0.000000e+00> : vector<8x32xf32>
    %209 = tpu.matmul %206, %208, %cst_84 {dimension_numbers = #tpu.dot_dimension_numbers<[1], [0], [0], [1], [0, 0, 1, 1], [], []>} : vector<8x32xbf16>, vector<32x32xbf16>, vector<8x32xf32> -> vector<8x32xf32>
    %c1_85 = arith.constant 1 : index
    %c0_86 = arith.constant 0 : index
    %c0_87 = arith.constant 0 : index
    %210 = vector.load %arg6[%c1_85, %c0_86, %c0_87] : memref<2x1x32xf32, #tpu.memory_space<vmem>>, vector<1x1x32xf32>
    %211 = vector.shape_cast %210 : vector<1x1x32xf32> to vector<1x32xf32>
    %212 = vector.broadcast %211 : vector<1x32xf32> to vector<8x32xf32>
    %213 = arith.addf %209, %212 : vector<8x32xf32>
    %214 = arith.addf %213, %160 : vector<8x32xf32>
    %c1_88 = arith.constant 1 : index
    %c0_89 = arith.constant 0 : index
    %c0_90 = arith.constant 0 : index
    %215 = vector.load %arg7[%c1_88, %c0_89, %c0_90] : memref<2x1x32xf32, #tpu.memory_space<vmem>>, vector<1x1x32xf32>
    %216 = vector.shape_cast %215 : vector<1x1x32xf32> to vector<1x32xf32>
    %c1_91 = arith.constant 1 : index
    %c0_92 = arith.constant 0 : index
    %c0_93 = arith.constant 0 : index
    %217 = vector.load %arg8[%c1_91, %c0_92, %c0_93] : memref<2x1x32xf32, #tpu.memory_space<vmem>>, vector<1x1x32xf32>
    %218 = vector.shape_cast %217 : vector<1x1x32xf32> to vector<1x32xf32>
    %cst_94 = arith.constant dense<0.000000e+00> : vector<8xf32>
    %219 = vector.multi_reduction <add>, %214, %cst_94 [1] : vector<8x32xf32> to vector<8xf32>
    %220 = vector.shape_cast %219 : vector<8xf32> to vector<8x1xf32>
    %cst_95 = arith.constant 3.200000e+01 : f32
    %221 = vector.broadcast %cst_95 : f32 to vector<8x1xf32>
    %222 = arith.divf %220, %221 : vector<8x1xf32>
    %223 = vector.broadcast %222 : vector<8x1xf32> to vector<8x32xf32>
    %224 = arith.subf %214, %223 : vector<8x32xf32>
    %225 = arith.mulf %224, %224 : vector<8x32xf32>
    %cst_96 = arith.constant dense<0.000000e+00> : vector<8xf32>
    %226 = vector.multi_reduction <add>, %225, %cst_96 [1] : vector<8x32xf32> to vector<8xf32>
    %227 = vector.shape_cast %226 : vector<8xf32> to vector<8x1xf32>
    %cst_97 = arith.constant 3.200000e+01 : f32
    %228 = vector.broadcast %cst_97 : f32 to vector<8x1xf32>
    %229 = arith.divf %227, %228 : vector<8x1xf32>
    %cst_98 = arith.constant 9.99999996E-13 : f32
    %230 = vector.broadcast %cst_98 : f32 to vector<8x1xf32>
    %231 = arith.addf %229, %230 : vector<8x1xf32>
    %232 = math.rsqrt %231 : vector<8x1xf32>
    %233 = vector.broadcast %232 : vector<8x1xf32> to vector<8x32xf32>
    %234 = arith.mulf %224, %233 : vector<8x32xf32>
    %235 = vector.broadcast %216 : vector<1x32xf32> to vector<8x32xf32>
    %236 = arith.mulf %234, %235 : vector<8x32xf32>
    %237 = vector.broadcast %218 : vector<1x32xf32> to vector<8x32xf32>
    %238 = arith.addf %236, %237 : vector<8x32xf32>
    %239 = arith.truncf %238 : vector<8x32xf32> to vector<8x32xbf16>
    %c1_99 = arith.constant 1 : index
    %c0_100 = arith.constant 0 : index
    %c0_101 = arith.constant 0 : index
    %240 = vector.load %arg9[%c1_99, %c0_100, %c0_101] : memref<2x32x64xbf16, #tpu.memory_space<vmem>>, vector<1x32x64xbf16>
    %241 = vector.shape_cast %240 : vector<1x32x64xbf16> to vector<32x64xbf16>
    %cst_102 = arith.constant dense<0.000000e+00> : vector<8x64xf32>
    %242 = tpu.matmul %239, %241, %cst_102 {dimension_numbers = #tpu.dot_dimension_numbers<[1], [0], [0], [1], [0, 0, 1, 1], [], []>} : vector<8x32xbf16>, vector<32x64xbf16>, vector<8x64xf32> -> vector<8x64xf32>
    %c1_103 = arith.constant 1 : index
    %c0_104 = arith.constant 0 : index
    %c0_105 = arith.constant 0 : index
    %243 = vector.load %arg10[%c1_103, %c0_104, %c0_105] : memref<2x1x64xf32, #tpu.memory_space<vmem>>, vector<1x1x64xf32>
    %244 = vector.shape_cast %243 : vector<1x1x64xf32> to vector<1x64xf32>
    %245 = vector.broadcast %244 : vector<1x64xf32> to vector<8x64xf32>
    %246 = arith.addf %242, %245 : vector<8x64xf32>
    %cst_106 = arith.constant 5.000000e-01 : f32
    %247 = vector.broadcast %cst_106 : f32 to vector<8x64xf32>
    %248 = arith.mulf %247, %246 : vector<8x64xf32>
    %cst_107 = arith.constant 4.471500e-02 : f32
    %249 = vector.broadcast %cst_107 : f32 to vector<8x64xf32>
    %250 = arith.mulf %249, %246 : vector<8x64xf32>
    %251 = arith.mulf %250, %246 : vector<8x64xf32>
    %252 = arith.mulf %251, %246 : vector<8x64xf32>
    %253 = arith.addf %246, %252 : vector<8x64xf32>
    %cst_108 = arith.constant 0.797884583 : f32
    %254 = vector.broadcast %cst_108 : f32 to vector<8x64xf32>
    %255 = arith.mulf %254, %253 : vector<8x64xf32>
    %256 = math.tanh %255 : vector<8x64xf32>
    %cst_109 = arith.constant 1.000000e+00 : f32
    %257 = vector.broadcast %cst_109 : f32 to vector<8x64xf32>
    %258 = arith.addf %257, %256 : vector<8x64xf32>
    %259 = arith.mulf %248, %258 : vector<8x64xf32>
    %260 = arith.truncf %259 : vector<8x64xf32> to vector<8x64xbf16>
    %c1_110 = arith.constant 1 : index
    %c0_111 = arith.constant 0 : index
    %c0_112 = arith.constant 0 : index
    %261 = vector.load %arg11[%c1_110, %c0_111, %c0_112] : memref<2x64x32xbf16, #tpu.memory_space<vmem>>, vector<1x64x32xbf16>
    %262 = vector.shape_cast %261 : vector<1x64x32xbf16> to vector<64x32xbf16>
    %cst_113 = arith.constant dense<0.000000e+00> : vector<8x32xf32>
    %263 = tpu.matmul %260, %262, %cst_113 {dimension_numbers = #tpu.dot_dimension_numbers<[1], [0], [0], [1], [0, 0, 1, 1], [], []>} : vector<8x64xbf16>, vector<64x32xbf16>, vector<8x32xf32> -> vector<8x32xf32>
    %c1_114 = arith.constant 1 : index
    %c0_115 = arith.constant 0 : index
    %c0_116 = arith.constant 0 : index
    %264 = vector.load %arg12[%c1_114, %c0_115, %c0_116] : memref<2x1x32xf32, #tpu.memory_space<vmem>>, vector<1x1x32xf32>
    %265 = vector.shape_cast %264 : vector<1x1x32xf32> to vector<1x32xf32>
    %266 = vector.broadcast %265 : vector<1x32xf32> to vector<8x32xf32>
    %267 = arith.addf %263, %266 : vector<8x32xf32>
    %268 = arith.addf %267, %238 : vector<8x32xf32>
    %c1_117 = arith.constant 1 : index
    %c0_118 = arith.constant 0 : index
    %c0_119 = arith.constant 0 : index
    %269 = vector.load %arg13[%c1_117, %c0_118, %c0_119] : memref<2x1x32xf32, #tpu.memory_space<vmem>>, vector<1x1x32xf32>
    %270 = vector.shape_cast %269 : vector<1x1x32xf32> to vector<1x32xf32>
    %c1_120 = arith.constant 1 : index
    %c0_121 = arith.constant 0 : index
    %c0_122 = arith.constant 0 : index
    %271 = vector.load %arg14[%c1_120, %c0_121, %c0_122] : memref<2x1x32xf32, #tpu.memory_space<vmem>>, vector<1x1x32xf32>
    %272 = vector.shape_cast %271 : vector<1x1x32xf32> to vector<1x32xf32>
    %cst_123 = arith.constant dense<0.000000e+00> : vector<8xf32>
    %273 = vector.multi_reduction <add>, %268, %cst_123 [1] : vector<8x32xf32> to vector<8xf32>
    %274 = vector.shape_cast %273 : vector<8xf32> to vector<8x1xf32>
    %cst_124 = arith.constant 3.200000e+01 : f32
    %275 = vector.broadcast %cst_124 : f32 to vector<8x1xf32>
    %276 = arith.divf %274, %275 : vector<8x1xf32>
    %277 = vector.broadcast %276 : vector<8x1xf32> to vector<8x32xf32>
    %278 = arith.subf %268, %277 : vector<8x32xf32>
    %279 = arith.mulf %278, %278 : vector<8x32xf32>
    %cst_125 = arith.constant dense<0.000000e+00> : vector<8xf32>
    %280 = vector.multi_reduction <add>, %279, %cst_125 [1] : vector<8x32xf32> to vector<8xf32>
    %281 = vector.shape_cast %280 : vector<8xf32> to vector<8x1xf32>
    %cst_126 = arith.constant 3.200000e+01 : f32
    %282 = vector.broadcast %cst_126 : f32 to vector<8x1xf32>
    %283 = arith.divf %281, %282 : vector<8x1xf32>
    %cst_127 = arith.constant 9.99999996E-13 : f32
    %284 = vector.broadcast %cst_127 : f32 to vector<8x1xf32>
    %285 = arith.addf %283, %284 : vector<8x1xf32>
    %286 = math.rsqrt %285 : vector<8x1xf32>
    %287 = vector.broadcast %286 : vector<8x1xf32> to vector<8x32xf32>
    %288 = arith.mulf %278, %287 : vector<8x32xf32>
    %289 = vector.broadcast %270 : vector<1x32xf32> to vector<8x32xf32>
    %290 = arith.mulf %288, %289 : vector<8x32xf32>
    %291 = vector.broadcast %272 : vector<1x32xf32> to vector<8x32xf32>
    %292 = arith.addf %290, %291 : vector<8x32xf32>
    %293 = arith.truncf %292 : vector<8x32xf32> to vector<8x32xbf16>
    %c0_128 = arith.constant 0 : index
    %c0_129 = arith.constant 0 : index
    %294 = vector.load %arg17[%c0_128, %c0_129] : memref<32x32xbf16, #tpu.memory_space<vmem>>, vector<32x32xbf16>
    %cst_130 = arith.constant dense<0.000000e+00> : vector<8x32xf32>
    %295 = tpu.matmul %293, %294, %cst_130 {dimension_numbers = #tpu.dot_dimension_numbers<[1], [0], [0], [1], [0, 0, 1, 1], [], []>} : vector<8x32xbf16>, vector<32x32xbf16>, vector<8x32xf32> -> vector<8x32xf32>
    %c0_131 = arith.constant 0 : index
    %c0_132 = arith.constant 0 : index
    %296 = vector.load %arg18[%c0_131, %c0_132] : memref<1x32xf32, #tpu.memory_space<vmem>>, vector<1x32xf32>
    %297 = vector.broadcast %296 : vector<1x32xf32> to vector<8x32xf32>
    %298 = arith.addf %295, %297 : vector<8x32xf32>
    %299 = math.tanh %298 : vector<8x32xf32>
    %300 = arith.truncf %299 : vector<8x32xf32> to vector<8x32xbf16>
    %c0_133 = arith.constant 0 : index
    %c0_134 = arith.constant 0 : index
    %301 = vector.load %arg19[%c0_133, %c0_134] : memref<32x128xbf16, #tpu.memory_space<vmem>>, vector<32x128xbf16>
    %cst_135 = arith.constant dense<0.000000e+00> : vector<8x128xf32>
    %302 = tpu.matmul %300, %301, %cst_135 {dimension_numbers = #tpu.dot_dimension_numbers<[1], [0], [0], [1], [0, 0, 1, 1], [], []>} : vector<8x32xbf16>, vector<32x128xbf16>, vector<8x128xf32> -> vector<8x128xf32>
    %c0_136 = arith.constant 0 : index
    %c0_137 = arith.constant 0 : index
    %303 = vector.load %arg20[%c0_136, %c0_137] : memref<1x128xf32, #tpu.memory_space<vmem>>, vector<1x128xf32>
    %304 = vector.broadcast %303 : vector<1x128xf32> to vector<8x128xf32>
    %305 = arith.addf %302, %304 : vector<8x128xf32>
    %c0_138 = arith.constant 0 : index
    %c0_139 = arith.constant 0 : index
    %c0_140 = arith.constant 0 : index
    %306 = vector.load %arg21[%c0_138, %c0_139, %c0_140] : memref<1x8x128xf32, #tpu.memory_space<vmem>>, vector<1x8x128xf32>
    %307 = vector.shape_cast %306 : vector<1x8x128xf32> to vector<8x128xf32>
    %308 = vector.shape_cast %305 : vector<8x128xf32> to vector<1x8x128xf32>
    tpu.vector_store %arg21[%c0_138, %c0_139, %c0_140], %308 {strides = array<i32>} : memref<1x8x128xf32, #tpu.memory_space<vmem>>, vector<1x8x128xf32>,
    return
  }
  func.func @transform_0(%arg0: i32) -> (i32, i32, i32) {
    %c0_i32 = arith.constant 0 : i32
    %c0_i32_0 = arith.constant 0 : i32
    %c0_i32_1 = arith.constant 0 : i32
    return %arg0, %c0_i32, %c0_i32_0 : i32, i32, i32
  }
  func.func @transform_1(%arg0: i32) -> (i32, i32, i32) {
    %c0_i32 = arith.constant 0 : i32
    %c0_i32_0 = arith.constant 0 : i32
    %c0_i32_1 = arith.constant 0 : i32
    return %arg0, %c0_i32, %c0_i32_0 : i32, i32, i32
  }
  func.func @transform_2(%arg0: i32) -> (i32, i32, i32) {
    %c0_i32 = arith.constant 0 : i32
    %c0_i32_0 = arith.constant 0 : i32
    %c0_i32_1 = arith.constant 0 : i32
    %c0_i32_2 = arith.constant 0 : i32
    return %c0_i32, %c0_i32_0, %c0_i32_1 : i32, i32, i32
  }
  func.func @transform_3(%arg0: i32) -> (i32, i32, i32) {
    %c0_i32 = arith.constant 0 : i32
    %c0_i32_0 = arith.constant 0 : i32
    %c0_i32_1 = arith.constant 0 : i32
    %c0_i32_2 = arith.constant 0 : i32
    return %c0_i32, %c0_i32_0, %c0_i32_1 : i32, i32, i32
  }
  func.func @transform_4(%arg0: i32) -> (i32, i32, i32) {
    %c0_i32 = arith.constant 0 : i32
    %c0_i32_0 = arith.constant 0 : i32
    %c0_i32_1 = arith.constant 0 : i32
    %c0_i32_2 = arith.constant 0 : i32
    return %c0_i32, %c0_i32_0, %c0_i32_1 : i32, i32, i32
  }
  func.func @transform_5(%arg0: i32) -> (i32, i32, i32) {
    %c0_i32 = arith.constant 0 : i32
    %c0_i32_0 = arith.constant 0 : i32
    %c0_i32_1 = arith.constant 0 : i32
    %c0_i32_2 = arith.constant 0 : i32
    return %c0_i32, %c0_i32_0, %c0_i32_1 : i32, i32, i32
  }
  func.func @transform_6(%arg0: i32) -> (i32, i32, i32) {
    %c0_i32 = arith.constant 0 : i32
    %c0_i32_0 = arith.constant 0 : i32
    %c0_i32_1 = arith.constant 0 : i32
    %c0_i32_2 = arith.constant 0 : i32
    return %c0_i32, %c0_i32_0, %c0_i32_1 : i32, i32, i32
  }
  func.func @transform_7(%arg0: i32) -> (i32, i32, i32) {
    %c0_i32 = arith.constant 0 : i32
    %c0_i32_0 = arith.constant 0 : i32
    %c0_i32_1 = arith.constant 0 : i32
    %c0_i32_2 = arith.constant 0 : i32
    return %c0_i32, %c0_i32_0, %c0_i32_1 : i32, i32, i32
  }
  func.func @transform_8(%arg0: i32) -> (i32, i32, i32) {
    %c0_i32 = arith.constant 0 : i32
    %c0_i32_0 = arith.constant 0 : i32
    %c0_i32_1 = arith.constant 0 : i32
    %c0_i32_2 = arith.constant 0 : i32
    return %c0_i32, %c0_i32_0, %c0_i32_1 : i32, i32, i32
  }
  func.func @transform_9(%arg0: i32) -> (i32, i32, i32) {
    %c0_i32 = arith.constant 0 : i32
    %c0_i32_0 = arith.constant 0 : i32
    %c0_i32_1 = arith.constant 0 : i32
    %c0_i32_2 = arith.constant 0 : i32
    return %c0_i32, %c0_i32_0, %c0_i32_1 : i32, i32, i32
  }
  func.func @transform_10(%arg0: i32) -> (i32, i32, i32) {
    %c0_i32 = arith.constant 0 : i32
    %c0_i32_0 = arith.constant 0 : i32
    %c0_i32_1 = arith.constant 0 : i32
    %c0_i32_2 = arith.constant 0 : i32
    return %c0_i32, %c0_i32_0, %c0_i32_1 : i32, i32, i32
  }
  func.func @transform_11(%arg0: i32) -> (i32, i32, i32) {
    %c0_i32 = arith.constant 0 : i32
    %c0_i32_0 = arith.constant 0 : i32
    %c0_i32_1 = arith.constant 0 : i32
    %c0_i32_2 = arith.constant 0 : i32
    return %c0_i32, %c0_i32_0, %c0_i32_1 : i32, i32, i32
  }
  func.func @transform_12(%arg0: i32) -> (i32, i32, i32) {
    %c0_i32 = arith.constant 0 : i32
    %c0_i32_0 = arith.constant 0 : i32
    %c0_i32_1 = arith.constant 0 : i32
    %c0_i32_2 = arith.constant 0 : i32
    return %c0_i32, %c0_i32_0, %c0_i32_1 : i32, i32, i32
  }
  func.func @transform_13(%arg0: i32) -> (i32, i32, i32) {
    %c0_i32 = arith.constant 0 : i32
    %c0_i32_0 = arith.constant 0 : i32
    %c0_i32_1 = arith.constant 0 : i32
    %c0_i32_2 = arith.constant 0 : i32
    return %c0_i32, %c0_i32_0, %c0_i32_1 : i32, i32, i32
  }
  func.func @transform_14(%arg0: i32) -> (i32, i32) {
    %c0_i32 = arith.constant 0 : i32
    %c0_i32_0 = arith.constant 0 : i32
    %c0_i32_1 = arith.constant 0 : i32
    return %c0_i32, %c0_i32_0 : i32, i32
  }
  func.func @transform_15(%arg0: i32) -> (i32, i32) {
    %c0_i32 = arith.constant 0 : i32
    %c0_i32_0 = arith.constant 0 : i32
    %c0_i32_1 = arith.constant 0 : i32
    return %c0_i32, %c0_i32_0 : i32, i32
  }
  func.func @transform_16(%arg0: i32) -> (i32, i32) {
    %c0_i32 = arith.constant 0 : i32
    %c0_i32_0 = arith.constant 0 : i32
    %c0_i32_1 = arith.constant 0 : i32
    return %c0_i32, %c0_i32_0 : i32, i32
  }
  func.func @transform_17(%arg0: i32) -> (i32, i32) {
    %c0_i32 = arith.constant 0 : i32
    %c0_i32_0 = arith.constant 0 : i32
    %c0_i32_1 = arith.constant 0 : i32
    return %c0_i32, %c0_i32_0 : i32, i32
  }
  func.func @transform_18(%arg0: i32) -> (i32, i32) {
    %c0_i32 = arith.constant 0 : i32
    %c0_i32_0 = arith.constant 0 : i32
    %c0_i32_1 = arith.constant 0 : i32
    return %c0_i32, %c0_i32_0 : i32, i32
  }
  func.func @transform_19(%arg0: i32) -> (i32, i32) {
    %c0_i32 = arith.constant 0 : i32
    %c0_i32_0 = arith.constant 0 : i32
    %c0_i32_1 = arith.constant 0 : i32
    return %c0_i32, %c0_i32_0 : i32, i32
  }
  func.func @transform_20(%arg0: i32) -> (i32, i32, i32) {
    %c0_i32 = arith.constant 0 : i32
    %c0_i32_0 = arith.constant 0 : i32
    %c0_i32_1 = arith.constant 0 : i32
    return %arg0, %c0_i32, %c0_i32_0 : i32, i32, i32
  }
}

</mosaic_0001>

<bundles_post_ra>
// kernel: bert_classifier_forward.1
= control target key start
LH: loop header
LB: loop body
LE: loop exit
PB: predicated region body
PF: predicated region fallthrough
CT: control target
= control target key end

     0   :  { %s2834_s0 = inlined_call_operand.vmem [shape: f32[2,8,32], index: 0, kind: input, shape index: {}]   ;;  %s2835_s1 = inlined_call_operand.vmem [shape: f32[2,1,8], index: 1, kind: input, shape index: {}]   ;;  %s2836_s2 = inlined_call_operand.vmem [shape: bf16[2,32,96], index: 2, kind: input, shape index: {}]   ;;  %s2837_s3 = inlined_call_operand.vmem [shape: f32[2,1,96], index: 3, kind: input, shape index: {}]   ;;  %s2838_s4 = inlined_call_operand.vmem [shape: bf16[2,32,32], index: 4, kind: input, shape index: {}]   ;;  %s2839_s5 = inlined_call_operand.vmem [shape: f32[2,1,32], index: 5, kind: input, shape index: {}]   ;;  %s2840_s6 = inlined_call_operand.vmem [shape: f32[2,1,32], index: 6, kind: input, shape index: {}]   ;;  %s2841_s7 = inlined_call_operand.vmem [shape: f32[2,1,32], index: 7, kind: input, shape index: {}]   ;;  %s2842_s8 = inlined_call_operand.vmem [shape: bf16[2,32,64], index: 8, kind: input, shape index: {}]   ;;  %s2843_s9 = inlined_call_operand.vmem [shape: f32[2,1,64], index: 9, kind: input, shape index: {}]   ;;  %s2844_s10 = inlined_call_operand.vmem [shape: bf16[2,64,32], index: 10, kind: input, shape index: {}]   ;;  %s2845_s11 = inlined_call_operand.vmem [shape: f32[2,1,32], index: 11, kind: input, shape index: {}]   ;;  %s2846_s12 = inlined_call_operand.vmem [shape: f32[2,1,32], index: 12, kind: input, shape index: {}]   ;;  %s2847_s13 = inlined_call_operand.vmem [shape: f32[2,1,32], index: 13, kind: input, shape index: {}]   ;;  %s2848_s14 = inlined_call_operand.vmem [shape: f32[1,32], index: 14, kind: input, shape index: {}]   ;;  %s2849_s15 = inlined_call_operand.vmem [shape: f32[1,32], index: 15, kind: input, shape index: {}]   ;;  %s2850_s16 = inlined_call_operand.vmem [shape: bf16[32,32], index: 16, kind: input, shape index: {}]   ;;  %s2851_s17 = inlined_call_operand.vmem [shape: f32[1,32], index: 17, kind: input, shape index: {}]   ;;  %s2852_s18 = inlined_call_operand.vmem [shape: bf16[32,128], index: 18, kind: input, shape index: {}]   ;;  %s2853_s19 = inlined_call_operand.vmem [shape: f32[1,128], index: 19, kind: input, shape index: {}]   ;;  %s2854_s20 = inlined_call_operand.vmem [shape: f32[2,8,128], index: 20, kind: output, shape index: {}]  }
   0x1   :  { %2862 = sst [smem:[#allocation2_spill]] %s2834_s0 }
   0x2   :  { %2863 = sst [smem:[#allocation3_spill]] %s2835_s1  ;;  %s2532_s1 = smov 0  }
   0x3   :  { %2864 = sst [smem:[#allocation4_spill]] %s2836_s2 }
   0x4   :  { %2865 = sst [smem:[#allocation5_spill]] %s2837_s3 }
   0x5   :  { %2866 = sst [smem:[#allocation6_spill]] %s2838_s4 }
   0x6 LB: > { %s2057_s22 = sadd.s32 4294967295, %s2419_s1   ;;  %p2061_p0 = scmp.ge.s32.totalorder %s2419_s1, 1  ;;  %s2419_s1 = sphi %s2532_s1, %s30_s1  }
   0x7   : > { %p569_p1 = scmp.lt.s32.totalorder %s2419_s1, 3 }
   0x9   : > { %p570_p2 = pnand %p2061_p0, %p569_p1 }
   0xa   : > { %p628_p3 = scmp.lt.s32.totalorder (!%p570_p2), %s2057_s22, 1  ;;  %s2867_s25 = sld [smem:[#allocation2_spill]] (!%p570_p2) }
   0xb   : > { %573 = sbr.rel (%p570_p2) target bundleno = 5728 (0x1660), region = 100  ;;  %s2868_s28 = sld [smem:[#allocation4_spill]] (!%p570_p2) }
   0xc   : > { %s2423_s26 = smov (!%p570_p2), 112   ;;  %s2424_s27 = smov (!%p570_p2), 96  }
   0xd   : > { %s2870_s30 = sld [smem:[#allocation3_spill]] (!%p570_p2)  ;;  %s2860_s21 = smov (!%p570_p2), 64  }
  0x10   : > { %s2876_s22 = smov (!%p628_p3, %s2057_s22), 1  ;;  %vm643_vm0 = vcmask 261120   ;;  %v2421_v8 = vmov 0.0   ;;  %vm2422_vm1 = vmmov 0   ;;  %v2064_v14 = vld [vmem:[%s2848_s14] ss:$0 sm:$0xff] }
  0x11   : > { %s2858_s23 = sshll.u32 %s2876_s22, 3  ;;  %v2357_v7 = vld [vmem:[%s2868_s28 + $0x8] sm:$0xff]   ;;  %2207 = vmatprep.subr.bf16.mxu0 %v2421_v8  ;;  %2211 = vmatprep.mubr.msk.bf16.mxu0 %vm2422_vm1, %v2421_v8  ;;  %v2358_v9 = vld [vmem:[%s2868_s28] sm:$0xff]   ;;  %vm755_vm2 = vcmask 130048   ;;  %vm851_vm3 = vcmask 64512   ;;  %vm881_vm4 = vcmask 1043456  }
  0x12   : > { %s631_s3 = scalar_lea.vmem %s2867_s25, %s2858_s23  ;;  %2208 = vmatpush3.bf16.msra.mxu0 %v2357_v7  ;;  %2215 = vmatprep.subr.bf16.mxu1 %v2421_v8  ;;  %v2065_v16 = vld [vmem:[%s2849_s15] ss:$0 sm:$0xff]  ;;  %s2871_s25 = sld [smem:[#allocation6_spill]]  ;;  %vm1191_vm5 = vcmask 523264  }
  0x13   : > { %v640_v0 = vld [vmem:[%s631_s3] sm:$0xff]  ;;  %2209 = vmatprep.subr.bf16.mxu0 %v2421_v8  ;;  %2217 = vmatprep.mubr.msk.bf16.mxu1 %vm2422_vm1, %v2421_v8  ;;  %s2869_s3 = sld [smem:[#allocation5_spill]]  ;;  %s634_s0 = scalar_lea.vmem %s2870_s30, %s2876_s22 }
  0x14   : > { %v644_v1 = vsel %vm643_vm0, %v640_v0, 0.0  ;;  %v2597_v33 = vld [vmem:[%s634_s0] ss:$0 sm:$0xff]  ;;  %s2859_s30 = smov 16   ;;  %s2873_s0 = smov 16  }
  0x15   : > { %645 = vadd.xlane.f32.xlu0 %v644_v1  ;;  %s2874_s29 = sshll.u32 %s2876_s22, 3 }
  0x16   : > { %2210 = vmatpush3.bf16.msra.mxu0 %v2358_v9 }
  0x17   : > { %2221 = vmatprep.subr.bf16.mxu0 %v2421_v8 }
  0x19   : > { %v2067_v20 = vld [vmem:[%s2869_s3] ss:$0 sm:$0xff] }
  0x9e   : > { %v646_v2 = vpop.xlane.xlu0 %645 }
  0x9f   : > { %v648_v3 = vmul.f32 0.03125, %v646_v2 }
  0xa1   : > { %v649_v4 = vsub.f32 %v640_v0, %v648_v3 }
  0xa3   : > { %v650_v5 = vmul.f32 %v649_v4, %v649_v4 }
  0xa5   : > { %v651_v6 = vsel %vm643_vm0, %v650_v5, 0.0 }
  0xa6   : > { %652 = vadd.xlane.f32.xlu0 %v651_v6 }
 0x12f   : > { %v653_v10 = vpop.xlane.xlu0 %652 }
 0x130   : > { %v654_v11 = vmul.f32 0.03125, %v653_v10  ;;  %v2360_v10 = vld [vmem:[%s2871_s25] sm:$0xff]  }
 0x132   : > { %v655_v12 = vadd.f32 1e-12, %v654_v11 }
 0x134   : > { %2381 = vrsqrt.f32 %v655_v12 }
 0x141   : > { %v2382_v13 = vpop.eup %2381 }
 0x142   : > { %v657_v15 = vmul.f32 %v2382_v13, %v649_v4  ;;  %v2359_v4 = vld [vmem:[%s2871_s25 + $0x8] sm:$0xff]  }
 0x144   : > { %v664_v17 = vmul.f32 %v2064_v14, %v657_v15 }
 0x146   : > { %v2570_v18 = vadd.f32 %v2065_v16, %v664_v17 }
 0x148   : > { %v679_v19 = vpack.c.bf16 %v2570_v18, %v2570_v18 }
 0x14a   : > { %2212 = vmatmul.mubr.msk.bf16.vlgmr.msra.gmra.mxu0 %vm643_vm0, %v679_v19  ;;  %v2075_v19 = vld [vmem:[%s2839_s5] ss:$0 sm:$0xff] }
 0x14b   : > { %2223 = vmatprep.mubr.msk.bf16.mxu0 %vm2422_vm1, %v2421_v8 }
 0x20a   : > { %v740_v21 = vpop.f32.mrf.mxu0 }
 0x20b   : > { %v741_v22 = vadd.f32 %v2067_v20, %v740_v21 }
 0x20c   : > { %v2213_v23 = vpop.f32.mrf.mxu0 }
 0x20d   : > { %v750_v24 = vpack.c.bf16 %v741_v22, %v741_v22  ;;  %747 = vrot.lane.b32.xlu1 %v741_v22, %s2423_s26 }
 0x20e   : > { %v743_v25 = vpop.f32.mrf.mxu0 }
 0x20f   : > { %753 = vrot.lane.b32.xlu0 %v750_v24, %s2424_s27 }
 0x210   : > { %v2214_v26 = vpop.f32.mrf.mxu0 }
 0x27f   : > { %v748_v27 = vpop.permute.xlu1 %747 }
 0x280   : > { %v751_v28 = vpack.c.bf16 %v748_v27, %v748_v27 }
 0x281   : > { %v754_v29 = vpop.permute.xlu0 %753 }
 0x282   : > { %803 = vrot.lane.b32.xlu1 %v751_v28, %s2424_s27  ;;  %v760_v30 = vsel %vm755_vm2, %v754_v29, 0 }
 0x283   : > { %2216 = vmatpush3.bf16.xpose.msra.mxu1 %v760_v30 }
 0x284   : > { %2227 = vmatprep.subr.bf16.mxu1 %v2421_v8 }
 0x28a   : > { %2218 = vmatmul.mubr.msk.bf16.vlgmr.msra.gmra.mxu1 %vm755_vm2, %v750_v24 }
 0x28b   : > { %2229 = vmatprep.mubr.msk.bf16.mxu1 %vm2422_vm1, %v2421_v8 }
 0x2f4   : > { %v804_v31 = vpop.permute.xlu1 %803 }
 0x2f5   : > { %v809_v32 = vsel %vm755_vm2, %v804_v31, 0 }
 0x2f6   : > { %2222 = vmatpush3.bf16.xpose.msra.mxu0 %v809_v32  ;;  %v2361_v32 = vld [vmem:[%s2842_s8 + $0x8] sm:$0xff]  }
 0x2f7   : > { %2233 = vmatprep.subr.bf16.mxu0 %v2421_v8 }
 0x2fd   : > { %2224 = vmatmul.mubr.msk.bf16.vlgmr.msra.gmra.mxu0 %vm755_vm2, %v751_v28 }
 0x2fe   : > { %2235 = vmatprep.mubr.msk.bf16.mxu0 %vm2422_vm1, %v2421_v8 }
 0x34a   : > { %v796_v34 = vpop.f32.mrf.mxu1 }
 0x34b   : > { %v797_v35 = vadd.f32 %v2597_v33, %v796_v34 }
 0x34c   : > { %v2219_v36 = vpop.f32.mrf.mxu1 }
 0x34d   : > { %v852_v37 = vsel %vm851_vm3, %v797_v35, -inf }
 0x34e   : > { %853 = vmax.xlane.f32.xlu0 %v852_v37  ;;  %v799_v38 = vpop.f32.mrf.mxu1 }
 0x34f   : > { %v2079_v38 = vld [vmem:[%s2840_s6] ss:$0 sm:$0xff] }
 0x350   : > { %v2220_v39 = vpop.f32.mrf.mxu1 }
 0x3bd   : > { %v845_v40 = vpop.f32.mrf.mxu0 }
 0x3be   : > { %v846_v41 = vadd.f32 %v2597_v33, %v845_v40  ;;  %v2080_v40 = vld [vmem:[%s2841_s7] ss:$0 sm:$0xff] }
 0x3bf   : > { %v2225_v42 = vpop.f32.mrf.mxu0 }
 0x3c0   : > { %v855_v43 = vsel %vm851_vm3, %v846_v41, -inf }
 0x3c1   : > { %856 = vmax.xlane.f32.xlu1 %v855_v43  ;;  %v848_v44 = vpop.f32.mrf.mxu0 }
 0x3c2   : > { %v2363_v44 = vld [vmem:[%s2844_s10 + $0x18] sm:$0xff]  }
 0x3c3   : > { %v2226_v45 = vpop.f32.mrf.mxu0 }
 0x3c4   : > { %v2364_v45 = vld [vmem:[%s2844_s10 + $0x10] sm:$0xff]  }
 0x3d7   : > { %v854_v46 = vpop.xlane.xlu0 %853 }
 0x3d8   : > { %v858_v47 = vsub.f32 %v797_v35, %v854_v46  ;;  %v2365_v46 = vld [vmem:[%s2844_s10 + $0x8] sm:$0xff]  }
 0x3da   : > { %v860_v48 = vmul.f32 1.442695, %v858_v47  ;;  %v2366_v47 = vld [vmem:[%s2844_s10] sm:$0xff]  }
 0x3dc   : > { %2383 = vpow2.f32 %v860_v48  ;;  %v2081_v48 = vld [vmem:[%s2843_s9] ss:$0 sm:$0xff] }
 0x3e9   : > { %v2384_v49 = vpop.eup %2383 }
 0x3ea   : > { %v864_v50 = vsel %vm851_vm3, %v2384_v49, 0.0 }
 0x3eb   : > { %865 = vadd.xlane.f32.xlu0 %v864_v50 }
 0x401   : > { %876 = vrot.lane.b32.xlu0 %v750_v24, %s2860_s21 }
 0x44a   : > { %v857_v51 = vpop.xlane.xlu1 %856 }
 0x44b   : > { %v859_v52 = vsub.f32 %v846_v41, %v857_v51 }
 0x44d   : > { %v862_v53 = vmul.f32 1.442695, %v859_v52 }
 0x44f   : > { %2385 = vpow2.f32 %v862_v53 }
 0x45c   : > { %v2386_v54 = vpop.eup %2385 }
 0x45d   : > { %v867_v55 = vsel %vm851_vm3, %v2386_v54, 0.0 }
 0x45e   : > { %868 = vadd.xlane.f32.xlu1 %v867_v55 }
 0x46f   : > { %925 = vrot.lane.b32.xlu1 %v751_v28, %s2860_s21 }
 0x474   : > { %v866_v56 = vpop.xlane.xlu0 %865 }
 0x475   : > { %2387 = vrcp.f32 %v866_v56 }
 0x478   : > { %v877_v57 = vpop.permute.xlu0 %876 }
 0x479   : > { %v883_v58 = vsel %vm881_vm4, %v877_v57, 0 }
 0x47a   : > { %2228 = vmatpush3.bf16.msra.mxu1 %v883_v58 }
 0x47b   : > { %2239 = vmatprep.subr.bf16.mxu1 %v2421_v8 }
 0x482   : > { %v2388_v59 = vpop.eup %2387 }
 0x483   : > { %v872_v60 = vmul.f32 %v2388_v59, %v2384_v49 }
 0x485   : > { %v874_v61 = vpack.c.bf16 %v872_v60, %v872_v60 }
 0x487   : > { %2230 = vmatmul.mubr.msk.bf16.vlgmr.msra.gmra.mxu1 %vm851_vm3, %v874_v61 }
 0x488   : > { %2243 = vmatprep.mubr.msk.bf16.mxu1 %vm2422_vm1, %v2421_v8  ;;  %2240 = vmatpush3.bf16.msra.mxu1 %v2359_v4 }
 0x489   : > { %2241 = vmatprep.subr.bf16.mxu1 %v2421_v8 }
 0x48c   : > { %2242 = vmatpush3.bf16.msra.mxu1 %v2360_v10 }
 0x48d   : > { %2255 = vmatprep.subr.bf16.mxu1 %v2421_v8 }
 0x4e7   : > { %v869_v62 = vpop.xlane.xlu1 %868 }
 0x4e8   : > { %2389 = vrcp.f32 %v869_v62 }
 0x4eb   : > { %v926_v63 = vpop.permute.xlu1 %925 }
 0x4ec   : > { %v931_v0 = vsel %vm881_vm4, %v926_v63, 0 }
 0x4ed   : > { %2234 = vmatpush3.bf16.msra.mxu0 %v931_v0  ;;  %v2085_v0 = vld [vmem:[%s2845_s11] ss:$0 sm:$0xff] }
 0x4ee   : > { %2247 = vmatprep.subr.bf16.mxu0 %v2421_v8 }
 0x4f5   : > { %v2390_v1 = vpop.eup %2389 }
 0x4f6   : > { %v873_v2 = vmul.f32 %v2390_v1, %v2386_v54 }
 0x4f8   : > { %v875_v3 = vpack.c.bf16 %v873_v2, %v873_v2 }
 0x4fa   : > { %2236 = vmatmul.mubr.msk.bf16.vlgmr.msra.gmra.mxu0 %vm851_vm3, %v875_v3 }
 0x4fb   : > { %2251 = vmatprep.mubr.msk.bf16.mxu0 %vm2422_vm1, %v2421_v8  ;;  %2248 = vmatpush3.bf16.msra.mxu0 %v2361_v32 }
 0x4fc   : > { %2249 = vmatprep.subr.bf16.mxu0 %v2421_v8 }
 0x547   : > { %v919_v5 = vpop.f32.mrf.mxu1 }
 0x549   : > { %v2231_v6 = vpop.f32.mrf.mxu1 }
 0x54b   : > { %v922_v7 = vpop.f32.mrf.mxu1 }
 0x54d   : > { %v2232_v9 = vpop.f32.mrf.mxu1 }
 0x5ba   : > { %v967_v11 = vpop.f32.mrf.mxu0 }
 0x5bb   : > { %974 = vrot.lane.b32.xlu1 %v967_v11, %s2859_s30  ;;  %s638_s30 = scalar_lea.vmem %s2854_s20, %s2874_s29 }
 0x5bc   : > { %v2237_v12 = vpop.f32.mrf.mxu0 }
 0x5be   : > { %v970_v13 = vpop.f32.mrf.mxu0 }
 0x5c0   : > { %v2238_v14 = vpop.f32.mrf.mxu0 }
 0x5c1   : > { %v2367_v14 = vld [vmem:[%s2868_s28 + $0x18] sm:$0xff]  }
 0x62d   : > { %v975_v15 = vpop.permute.xlu1 %974 }
 0x62e   : > { %v977_v16 = vsel %vm755_vm2, %v919_v5, %v975_v15  ;;  %v2368_v15 = vld [vmem:[%s2868_s28 + $0x10] sm:$0xff]  }
 0x62f   : > { %v978_v17 = vpack.c.bf16 %v977_v16, %v977_v16 }
 0x631   : > { %2244 = vmatmul.mubr.msk.bf16.vlgmr.msra.gmra.mxu1 %vm643_vm0, %v978_v17 }
 0x632   : > { %2263 = vmatprep.mubr.msk.bf16.mxu1 %vm2422_vm1, %v2421_v8  ;;  %2256 = vmatpush3.bf16.msra.mxu1 %v2363_v44 }
 0x633   : > { %2257 = vmatprep.subr.bf16.mxu1 %v2421_v8 }
 0x636   : > { %2258 = vmatpush3.bf16.msra.mxu1 %v2364_v45 }
 0x637   : > { %2259 = vmatprep.subr.bf16.mxu1 %v2421_v8 }
 0x63a   : > { %2260 = vmatpush3.bf16.msra.mxu1 %v2365_v46 }
 0x63b   : > { %2261 = vmatprep.subr.bf16.mxu1 %v2421_v8 }
 0x63e   : > { %2262 = vmatpush3.bf16.msra.mxu1 %v2366_v47 }
 0x63f   : > { %2281 = vmatprep.subr.bf16.mxu1 %v2421_v8 }
 0x6f1   : > { %v1039_v20 = vpop.f32.mrf.mxu1 }
 0x6f2   : > { %v1040_v21 = vadd.f32 %v2075_v19, %v1039_v20 }
 0x6f3   : > { %v2245_v22 = vpop.f32.mrf.mxu1 }
 0x6f4   : > { %v1045_v23 = vadd.f32 %v1040_v21, %v2570_v18  ;;  %v2362_v18 = vld [vmem:[%s2842_s8] sm:$0xff]  }
 0x6f5   : > { %v1042_v24 = vpop.f32.mrf.mxu1  ;;  %2250 = vmatpush3.bf16.msra.mxu0 %v2362_v18  ;;  %v2091_v21 = vld [vmem:[%s2846_s12] ss:$0 sm:$0xff] }
 0x6f6   : > { %v1048_v25 = vsel %vm643_vm0, %v1045_v23, 0.0  ;;  %2267 = vmatprep.subr.bf16.mxu0 %v2421_v8 }
 0x6f7   : > { %1049 = vadd.xlane.f32.xlu1 %v1048_v25  ;;  %v2246_v26 = vpop.f32.mrf.mxu1 }
 0x780   : > { %v1050_v27 = vpop.xlane.xlu1 %1049 }
 0x781   : > { %v1051_v28 = vmul.f32 0.03125, %v1050_v27  ;;  %v2098_v27 = vld [vmem:[%s2869_s3 + $0x1] ss:$0 sm:$0xff] }
 0x783   : > { %v1052_v29 = vsub.f32 %v1045_v23, %v1051_v28  ;;  %v2092_v23 = vld [vmem:[%s2847_s13] ss:$0 sm:$0xff] }
 0x785   : > { %v1053_v30 = vmul.f32 %v1052_v29, %v1052_v29 }
 0x787   : > { %v1054_v31 = vsel %vm643_vm0, %v1053_v30, 0.0 }
 0x788   : > { %1055 = vadd.xlane.f32.xlu0 %v1054_v31 }
 0x811   : > { %v1056_v34 = vpop.xlane.xlu0 %1055 }
 0x812   : > { %v1057_v35 = vmul.f32 0.03125, %v1056_v34 }
 0x814   : > { %v1058_v36 = vadd.f32 1e-12, %v1057_v35 }
 0x816   : > { %2391 = vrsqrt.f32 %v1058_v36 }
 0x823   : > { %v2392_v37 = vpop.eup %2391 }
 0x824   : > { %v1060_v39 = vmul.f32 %v2392_v37, %v1052_v29 }
 0x826   : > { %v1067_v41 = vmul.f32 %v2079_v38, %v1060_v39 }
 0x828   : > { %v1074_v42 = vadd.f32 %v2080_v40, %v1067_v41 }
 0x82a   : > { %v1075_v43 = vpack.c.bf16 %v1074_v42, %v1074_v42 }
 0x82c   : > { %2252 = vmatmul.mubr.msk.bf16.vlgmr.msra.gmra.mxu0 %vm643_vm0, %v1075_v43 }
 0x82d   : > { %2271 = vmatprep.mubr.msk.bf16.mxu0 %vm2422_vm1, %v2421_v8  ;;  %2268 = vmatpush3.bf16.msra.mxu0 %v2367_v14 }
 0x82e   : > { %2269 = vmatprep.subr.bf16.mxu0 %v2421_v8 }
 0x831   : > { %2270 = vmatpush3.bf16.msra.mxu0 %v2368_v15 }
 0x832   : > { %2275 = vmatprep.subr.bf16.mxu0 %v2421_v8 }
 0x8ec   : > { %v1136_v49 = vpop.f32.mrf.mxu0 }
 0x8ed   : > { %v1137_v50 = vadd.f32 %v2081_v48, %v1136_v49 }
 0x8ee   : > { %v2253_v51 = vpop.f32.mrf.mxu0 }
 0x8ef   : > { %v1143_v52 = vmul.f32 0.044715, %v1137_v50  ;;  %v1142_v60 = vmul.f32 0.5, %v1137_v50 }
 0x8f0   : > { %v1139_v53 = vpop.f32.mrf.mxu0 }
 0x8f1   : > { %v1144_v54 = vmul.f32 %v1143_v52, %v1137_v50 }
 0x8f2   : > { %v2254_v55 = vpop.f32.mrf.mxu0 }
 0x8f3   : > { %v1145_v56 = vmul.f32 %v1144_v54, %v1137_v50 }
 0x8f5   : > { %v1146_v57 = vadd.f32 %v1145_v56, %v1137_v50 }
 0x8f7   : > { %v1147_v58 = vmul.f32 0.7978846, %v1146_v57 }
 0x8f9   : > { %2393 = vtanh.f32 %v1147_v58 }
 0x906   : > { %v2394_v59 = vpop.eup %2393 }
 0x907   : > { %v1149_v61 = vadd.f32 1.0, %v2394_v59 }
 0x909   : > { %v1150_v62 = vmul.f32 %v1149_v61, %v1142_v60 }
 0x90b   : > { %v1151_v63 = vpack.c.bf16 %v1150_v62, %v1150_v62 }
 0x90d   : > { %2264 = vmatmul.mubr.msk.bf16.vlgmr.msra.gmra.mxu1 %vm1191_vm5, %v1151_v63 }
 0x90e   : > { %2283 = vmatprep.mubr.msk.bf16.mxu1 %vm2422_vm1, %v2421_v8 }
 0x9cd   : > { %v1229_v1 = vpop.f32.mrf.mxu1 }
 0x9ce   : > { %v1230_v2 = vadd.f32 %v2085_v0, %v1229_v1 }
 0x9cf   : > { %v2265_v3 = vpop.f32.mrf.mxu1 }
 0x9d0   : > { %v1235_v4 = vadd.f32 %v1230_v2, %v1074_v42 }
 0x9d1   : > { %v1232_v5 = vpop.f32.mrf.mxu1 }
 0x9d2   : > { %v1238_v6 = vsel %vm643_vm0, %v1235_v4, 0.0 }
 0x9d3   : > { %1239 = vadd.xlane.f32.xlu1 %v1238_v6  ;;  %v2266_v7 = vpop.f32.mrf.mxu1 }
 0xa5c   : > { %v1240_v9 = vpop.xlane.xlu1 %1239 }
 0xa5d   : > { %v1241_v10 = vmul.f32 0.03125, %v1240_v9 }
 0xa5f   : > { %v1242_v11 = vsub.f32 %v1235_v4, %v1241_v10  ;;  %v2369_v10 = vld [vmem:[%s2871_s25 + $0x18] sm:$0xff]  }
 0xa61   : > { %v1243_v12 = vmul.f32 %v1242_v11, %v1242_v11 }
 0xa63   : > { %v1244_v13 = vsel %vm643_vm0, %v1243_v12, 0.0 }
 0xa64   : > { %1245 = vadd.xlane.f32.xlu1 %v1244_v13 }
 0xaed   : > { %v1246_v16 = vpop.xlane.xlu1 %1245 }
 0xaee   : > { %v1247_v17 = vmul.f32 0.03125, %v1246_v16 }
 0xaf0   : > { %v1248_v19 = vadd.f32 1e-12, %v1247_v17 }
 0xaf2   : > { %2395 = vrsqrt.f32 %v1248_v19 }
 0xaff   : > { %v2396_v20 = vpop.eup %2395 }
 0xb00   : > { %v1250_v22 = vmul.f32 %v2396_v20, %v1242_v11  ;;  %v2370_v11 = vld [vmem:[%s2871_s25 + $0x10] sm:$0xff]  }
 0xb02   : > { %v1257_v24 = vmul.f32 %v2091_v21, %v1250_v22 }
 0xb04   : > { %v2694_v25 = vadd.f32 %v2092_v23, %v1257_v24  ;;  %v2111_v24 = vld [vmem:[%s2839_s5 + $0x1] ss:$0 sm:$0xff] }
 0xb06   : > { %v1265_v26 = vpack.c.bf16 %v2694_v25, %v2694_v25 }
 0xb08   : > { %2272 = vmatmul.mubr.msk.bf16.vlgmr.msra.gmra.mxu0 %vm643_vm0, %v1265_v26 }
 0xb09   : > { %2277 = vmatprep.mubr.msk.bf16.mxu0 %vm2422_vm1, %v2421_v8 }
 0xbc8   : > { %v1328_v28 = vpop.f32.mrf.mxu0 }
 0xbc9   : > { %v1329_v29 = vadd.f32 %v2098_v27, %v1328_v28 }
 0xbca   : > { %v2273_v30 = vpop.f32.mrf.mxu0 }
 0xbcb   : > { %1335 = vrot.lane.b32.xlu1 %v1329_v29, %s2423_s26  ;;  %v1338_v32 = vpack.c.bf16 %v1329_v29, %v1329_v29  ;;  %s2872_s26 = smov 64  }
 0xbcc   : > { %v1331_v31 = vpop.f32.mrf.mxu0 }
 0xbce   : > { %v2274_v18 = vpop.f32.mrf.mxu0 }
 0xbcf   : > { %1341 = vrot.lane.b32.xlu1 %v1338_v32, %s2424_s27 }
 0xc3d   : > { %v1336_v34 = vpop.permute.xlu1 %1335 }
 0xc3e   : > { %v1339_v35 = vpack.c.bf16 %v1336_v34, %v1336_v34 }
 0xc40   : > { %1390 = vrot.lane.b32.xlu0 %v1339_v35, %s2424_s27 }
 0xc41   : > { %v1342_v36 = vpop.permute.xlu1 %1341 }
 0xc42   : > { %v1347_v37 = vsel %vm755_vm2, %v1342_v36, 0 }
 0xc43   : > { %2276 = vmatpush3.bf16.xpose.msra.mxu0 %v1347_v37 }
 0xc44   : > { %2287 = vmatprep.subr.bf16.mxu0 %v2421_v8 }
 0xc4a   : > { %2278 = vmatmul.mubr.msk.bf16.vlgmr.msra.gmra.mxu0 %vm755_vm2, %v1338_v32 }
 0xc4b   : > { %2289 = vmatprep.mubr.msk.bf16.mxu0 %vm2422_vm1, %v2421_v8 }
 0xcb2   : > { %v1391_v38 = vpop.permute.xlu0 %1390 }
 0xcb3   : > { %v1396_v39 = vsel %vm755_vm2, %v1391_v38, 0  ;;  %v2371_v38 = vld [vmem:[%s2842_s8 + $0x18] sm:$0xff]  }
 0xcb4   : > { %2282 = vmatpush3.bf16.xpose.msra.mxu1 %v1396_v39 }
 0xcb5   : > { %2293 = vmatprep.subr.bf16.mxu1 %v2421_v8 }
 0xcbb   : > { %2284 = vmatmul.mubr.msk.bf16.vlgmr.msra.gmra.mxu1 %vm755_vm2, %v1339_v35 }
 0xcbc   : > { %2295 = vmatprep.mubr.msk.bf16.mxu1 %vm2422_vm1, %v2421_v8 }
 0xd0a   : > { %v1383_v40 = vpop.f32.mrf.mxu0 }
 0xd0b   : > { %v1384_v41 = vadd.f32 %v2597_v33, %v1383_v40 }
 0xd0c   : > { %v2279_v42 = vpop.f32.mrf.mxu0 }
 0xd0d   : > { %v1438_v43 = vsel %vm851_vm3, %v1384_v41, -inf }
 0xd0e   : > { %1439 = vmax.xlane.f32.xlu0 %v1438_v43  ;;  %v1386_v44 = vpop.f32.mrf.mxu0  ;;  %v2117_v43 = vld [vmem:[%s2840_s6 + $0x1] ss:$0 sm:$0xff] }
 0xd10   : > { %v2280_v45 = vpop.f32.mrf.mxu0 }
 0xd11   : > { %v2118_v45 = vld [vmem:[%s2841_s7 + $0x1] ss:$0 sm:$0xff] }
 0xd24   : > { %1510 = vrot.lane.b32.xlu0 %v1339_v35, %s2872_s26 }
 0xd7b   : > { %v1432_v46 = vpop.f32.mrf.mxu1 }
 0xd7c   : > { %v1433_v47 = vadd.f32 %v2597_v33, %v1432_v46 }
 0xd7d   : > { %v2285_v48 = vpop.f32.mrf.mxu1 }
 0xd7e   : > { %v1441_v49 = vsel %vm851_vm3, %v1433_v47, -inf }
 0xd7f   : > { %v1435_v50 = vpop.f32.mrf.mxu1  ;;  %1442 = vmax.xlane.f32.xlu1 %v1441_v49  ;;  %v2373_v49 = vld [vmem:[%s2844_s10 + $0x38] sm:$0xff]  }
 0xd80   : > { %v2374_v50 = vld [vmem:[%s2844_s10 + $0x30] sm:$0xff]  }
 0xd81   : > { %v2286_v51 = vpop.f32.mrf.mxu1 }
 0xd82   : > { %v2375_v51 = vld [vmem:[%s2844_s10 + $0x28] sm:$0xff]  }
 0xd97   : > { %v1440_v52 = vpop.xlane.xlu0 %1439 }
 0xd98   : > { %v1444_v55 = vsub.f32 %v1384_v41, %v1440_v52  ;;  %v2376_v52 = vld [vmem:[%s2844_s10 + $0x20] sm:$0xff]  }
 0xd9a   : > { %v1446_v58 = vmul.f32 1.442695, %v1444_v55 }
 0xd9b   : > { %v1511_v53 = vpop.permute.xlu0 %1510 }
 0xd9c   : > { %v1516_v54 = vsel %vm881_vm4, %v1511_v53, 0  ;;  %v2124_v53 = vld [vmem:[%s2843_s9 + $0x1] ss:$0 sm:$0xff] }
 0xd9d   : > { %2294 = vmatpush3.bf16.msra.mxu1 %v1516_v54 }
 0xd9e   : > { %2307 = vmatprep.subr.bf16.mxu1 %v2421_v8 }
 0xe08   : > { %v1443_v56 = vpop.xlane.xlu1 %1442 }
 0xe09   : > { %v1445_v57 = vsub.f32 %v1433_v47, %v1443_v56 }
 0xe0b   : > { %v1448_v59 = vmul.f32 1.442695, %v1445_v57 }
 0xe0d   : > { %2397 = vpow2.f32 %v1448_v59 }
 0xe0e   : > { %2399 = vpow2.f32 %v1446_v58 }
 0xe1a   : > { %v2398_v33 = vpop.eup %2397 }
 0xe1b   : > { %v1453_v60 = vsel %vm851_vm3, %v2398_v33, 0.0  ;;  %v2400_v61 = vpop.eup %2399 }
 0xe1c   : > { %1454 = vadd.xlane.f32.xlu1 %v1453_v60  ;;  %v1450_v62 = vsel %vm851_vm3, %v2400_v61, 0.0 }
 0xe20   : > { %1451 = vadd.xlane.f32.xlu1 %v1450_v62 }
 0xe31   : > { %1462 = vrot.lane.b32.xlu1 %v1338_v32, %s2872_s26 }
 0xea5   : > { %v1455_v63 = vpop.xlane.xlu1 %1454 }
 0xea6   : > { %2401 = vrcp.f32 %v1455_v63 }
 0xea9   : > { %v1452_v0 = vpop.xlane.xlu1 %1451 }
 0xeaa   : > { %2403 = vrcp.f32 %v1452_v0 }
 0xead   : > { %v1463_v1 = vpop.permute.xlu1 %1462 }
 0xeae   : > { %v1468_v2 = vsel %vm881_vm4, %v1463_v1, 0 }
 0xeaf   : > { %2288 = vmatpush3.bf16.msra.mxu0 %v1468_v2 }
 0xeb0   : > { %2299 = vmatprep.subr.bf16.mxu0 %v2421_v8 }
 0xeb3   : > { %v2402_v3 = vpop.eup %2401 }
 0xeb4   : > { %v1459_v4 = vmul.f32 %v2402_v3, %v2398_v33 }
 0xeb6   : > { %v1461_v5 = vpack.c.bf16 %v1459_v4, %v1459_v4  ;;  %v2137_v4 = vld [vmem:[%s2845_s11 + $0x1] ss:$0 sm:$0xff] }
 0xeb7   : > { %v2404_v6 = vpop.eup %2403 }
 0xeb8   : > { %2296 = vmatmul.mubr.msk.bf16.vlgmr.msra.gmra.mxu1 %vm851_vm3, %v1461_v5  ;;  %v1458_v7 = vmul.f32 %v2404_v6, %v2400_v61 }
 0xeb9   : > { %2311 = vmatprep.mubr.msk.bf16.mxu1 %vm2422_vm1, %v2421_v8  ;;  %2308 = vmatpush3.bf16.msra.mxu1 %v2371_v38 }
 0xeba   : > { %v1460_v9 = vpack.c.bf16 %v1458_v7, %v1458_v7  ;;  %2309 = vmatprep.subr.bf16.mxu1 %v2421_v8 }
 0xebc   : > { %2290 = vmatmul.mubr.msk.bf16.vlgmr.msra.gmra.mxu0 %vm851_vm3, %v1460_v9 }
 0xebd   : > { %2303 = vmatprep.mubr.msk.bf16.mxu0 %vm2422_vm1, %v2421_v8  ;;  %2300 = vmatpush3.bf16.msra.mxu0 %v2369_v10 }
 0xebe   : > { %2301 = vmatprep.subr.bf16.mxu0 %v2421_v8 }
 0xec1   : > { %2302 = vmatpush3.bf16.msra.mxu0 %v2370_v11 }
 0xec2   : > { %2315 = vmatprep.subr.bf16.mxu0 %v2421_v8 }
 0xf78   : > { %v1552_v12 = vpop.f32.mrf.mxu1 }
 0xf79   : > { %1559 = vrot.lane.b32.xlu0 %v1552_v12, %s2873_s0 }
 0xf7a   : > { %v2297_v13 = vpop.f32.mrf.mxu1 }
 0xf7c   : > { %v1504_v14 = vpop.f32.mrf.mxu0  ;;  %v1555_v15 = vpop.f32.mrf.mxu1 }
 0xf7e   : > { %v2291_v16 = vpop.f32.mrf.mxu0  ;;  %v2298_v17 = vpop.f32.mrf.mxu1 }
 0xf80   : > { %v1507_v19 = vpop.f32.mrf.mxu0 }
 0xf81   : > { %v2377_v19 = vld [vmem:[%s2850_s16 + $0x8] sm:$0xff]  }
 0xf82   : > { %v2292_v20 = vpop.f32.mrf.mxu0 }
 0xf83   : > { %v2378_v20 = vld [vmem:[%s2850_s16] sm:$0xff]  }
 0xfeb   : > { %v1560_v21 = vpop.permute.xlu0 %1559 }
 0xfec   : > { %v1562_v22 = vsel %vm755_vm2, %v1504_v14, %v1560_v21 }
 0xfed   : > { %v1563_v23 = vpack.c.bf16 %v1562_v22, %v1562_v22 }
 0xfef   : > { %2304 = vmatmul.mubr.msk.bf16.vlgmr.msra.gmra.mxu0 %vm643_vm0, %v1563_v23 }
 0xff0   : > { %2323 = vmatprep.mubr.msk.bf16.mxu0 %vm2422_vm1, %v2421_v8  ;;  %2316 = vmatpush3.bf16.msra.mxu0 %v2373_v49 }
 0xff1   : > { %2317 = vmatprep.subr.bf16.mxu0 %v2421_v8 }
 0xff4   : > { %2318 = vmatpush3.bf16.msra.mxu0 %v2374_v50 }
 0xff5   : > { %2319 = vmatprep.subr.bf16.mxu0 %v2421_v8 }
 0xff8   : > { %2320 = vmatpush3.bf16.msra.mxu0 %v2375_v51 }
 0xff9   : > { %2321 = vmatprep.subr.bf16.mxu0 %v2421_v8 }
 0xffc   : > { %2322 = vmatpush3.bf16.msra.mxu0 %v2376_v52 }
0x10af   : > { %v1626_v26 = vpop.f32.mrf.mxu0 }
0x10b0   : > { %v1627_v27 = vadd.f32 %v2111_v24, %v1626_v26  ;;  %v2145_v26 = vld [vmem:[%s2846_s12 + $0x1] ss:$0 sm:$0xff] }
0x10b1   : > { %v2305_v28 = vpop.f32.mrf.mxu0 }
0x10b2   : > { %v1632_v29 = vadd.f32 %v1627_v27, %v2694_v25  ;;  %v2372_v25 = vld [vmem:[%s2842_s8 + $0x10] sm:$0xff]   ;;  %v2146_v28 = vld [vmem:[%s2847_s13 + $0x1] ss:$0 sm:$0xff] }
0x10b3   : > { %v1629_v30 = vpop.f32.mrf.mxu0  ;;  %2310 = vmatpush3.bf16.msra.mxu1 %v2372_v25 }
0x10b4   : > { %v1637_v31 = vsel %vm643_vm0, %v1632_v29, 0.0  ;;  %2327 = vmatprep.subr.bf16.mxu1 %v2421_v8 }
0x10b5   : > { %1638 = vadd.xlane.f32.xlu1 %v1637_v31  ;;  %v2306_v32 = vpop.f32.mrf.mxu0 }
0x10b6   : > { %v2379_v32 = vld [vmem:[%s2852_s18 + $0x8] sm:$0xff]  }
0x113e   : > { %v1639_v18 = vpop.xlane.xlu1 %1638 }
0x113f   : > { %v1640_v34 = vmul.f32 0.03125, %v1639_v18  ;;  %v2380_v18 = vld [vmem:[%s2852_s18] sm:$0xff]  }
0x1141   : > { %v1641_v35 = vsub.f32 %v1632_v29, %v1640_v34  ;;  %v2147_v34 = vld [vmem:[%s2851_s17] ss:$0 sm:$0xff] }
0x1143   : > { %v1642_v36 = vmul.f32 %v1641_v35, %v1641_v35 }
0x1145   : > { %v1643_v37 = vsel %vm643_vm0, %v1642_v36, 0.0 }
0x1146   : > { %1644 = vadd.xlane.f32.xlu0 %v1643_v37 }
0x11cf   : > { %v1645_v39 = vpop.xlane.xlu0 %1644 }
0x11d0   : > { %v1646_v40 = vmul.f32 0.03125, %v1645_v39 }
0x11d2   : > { %v1647_v41 = vadd.f32 1e-12, %v1646_v40 }
0x11d4   : > { %2405 = vrsqrt.f32 %v1647_v41 }
0x11e1   : > { %v2406_v42 = vpop.eup %2405 }
0x11e2   : > { %v1649_v44 = vmul.f32 %v2406_v42, %v1641_v35 }
0x11e4   : > { %v1656_v46 = vmul.f32 %v2117_v43, %v1649_v44 }
0x11e6   : > { %v1663_v47 = vadd.f32 %v2118_v45, %v1656_v46 }
0x11e8   : > { %v1664_v48 = vpack.c.bf16 %v1663_v47, %v1663_v47 }
0x11ea   : > { %2312 = vmatmul.mubr.msk.bf16.vlgmr.msra.gmra.mxu1 %vm643_vm0, %v1664_v48 }
0x11eb   : > { %2331 = vmatprep.mubr.msk.bf16.mxu1 %vm2422_vm1, %v2421_v8  ;;  %2328 = vmatpush3.bf16.msra.mxu1 %v2377_v19 }
0x11ec   : > { %2329 = vmatprep.subr.bf16.mxu1 %v2421_v8 }
0x11ef   : > { %2330 = vmatpush3.bf16.msra.mxu1 %v2378_v20 }
0x11f0   : > { %2335 = vmatprep.subr.bf16.mxu1 %v2421_v8 }
0x12aa   : > { %v1727_v54 = vpop.f32.mrf.mxu1 }
0x12ab   : > { %v1728_v55 = vadd.f32 %v2124_v53, %v1727_v54 }
0x12ac   : > { %v2313_v56 = vpop.f32.mrf.mxu1 }
0x12ad   : > { %v1734_v57 = vmul.f32 0.044715, %v1728_v55  ;;  %v1733_v0 = vmul.f32 0.5, %v1728_v55 }
0x12ae   : > { %v1730_v58 = vpop.f32.mrf.mxu1 }
0x12af   : > { %v1735_v59 = vmul.f32 %v1734_v57, %v1728_v55 }
0x12b0   : > { %v2314_v33 = vpop.f32.mrf.mxu1 }
0x12b1   : > { %v1736_v60 = vmul.f32 %v1735_v59, %v1728_v55 }
0x12b3   : > { %v1737_v61 = vadd.f32 %v1736_v60, %v1728_v55 }
0x12b5   : > { %v1738_v62 = vmul.f32 0.7978846, %v1737_v61 }
0x12b7   : > { %2407 = vtanh.f32 %v1738_v62 }
0x12c4   : > { %v2408_v63 = vpop.eup %2407 }
0x12c5   : > { %v1740_v1 = vadd.f32 1.0, %v2408_v63 }
0x12c7   : > { %v1741_v2 = vmul.f32 %v1740_v1, %v1733_v0 }
0x12c9   : > { %v1742_v3 = vpack.c.bf16 %v1741_v2, %v1741_v2 }
0x12cb   : > { %2324 = vmatmul.mubr.msk.bf16.vlgmr.msra.gmra.mxu0 %vm1191_vm5, %v1742_v3 }
0x138b   : > { %v1821_v5 = vpop.f32.mrf.mxu0 }
0x138c   : > { %v1822_v6 = vadd.f32 %v2137_v4, %v1821_v5 }
0x138d   : > { %v2325_v7 = vpop.f32.mrf.mxu0 }
0x138e   : > { %v1827_v9 = vadd.f32 %v1822_v6, %v1663_v47 }
0x138f   : > { %v1824_v10 = vpop.f32.mrf.mxu0 }
0x1390   : > { %v1832_v11 = vsel %vm643_vm0, %v1827_v9, 0.0 }
0x1391   : > { %1833 = vadd.xlane.f32.xlu0 %v1832_v11  ;;  %v2326_v12 = vpop.f32.mrf.mxu0 }
0x141a   : > { %v1834_v13 = vpop.xlane.xlu0 %1833 }
0x141b   : > { %v1835_v14 = vmul.f32 0.03125, %v1834_v13 }
0x141d   : > { %v1836_v15 = vsub.f32 %v1827_v9, %v1835_v14 }
0x141f   : > { %v1837_v16 = vmul.f32 %v1836_v15, %v1836_v15 }
0x1421   : > { %v1838_v17 = vsel %vm643_vm0, %v1837_v16, 0.0 }
0x1422   : > { %1839 = vadd.xlane.f32.xlu1 %v1838_v17 }
0x14ab   : > { %v1840_v21 = vpop.xlane.xlu1 %1839 }
0x14ac   : > { %v1841_v22 = vmul.f32 0.03125, %v1840_v21 }
0x14ae   : > { %v1842_v23 = vadd.f32 1e-12, %v1841_v22 }
0x14b0   : > { %2409 = vrsqrt.f32 %v1842_v23 }
0x14bd   : > { %v2410_v24 = vpop.eup %2409 }
0x14be   : > { %v1844_v27 = vmul.f32 %v2410_v24, %v1836_v15 }
0x14c0   : > { %v1851_v29 = vmul.f32 %v2145_v26, %v1844_v27 }
0x14c2   : > { %v1858_v30 = vadd.f32 %v2146_v28, %v1851_v29 }
0x14c4   : > { %v1859_v31 = vpack.c.bf16 %v1858_v30, %v1858_v30 }
0x14c6   : > { %2332 = vmatmul.mubr.msk.bf16.vlgmr.msra.gmra.mxu1 %vm643_vm0, %v1859_v31 }
0x14c7   : > { %2339 = vmatprep.mubr.msk.bf16.mxu1 %vm2422_vm1, %v2421_v8  ;;  %2336 = vmatpush3.bf16.msra.mxu1 %v2379_v32 }
0x14c8   : > { %2337 = vmatprep.subr.bf16.mxu1 %v2421_v8  ;;  %v2151_v8 = vld [vmem:[%s2853_s19] ss:$0 sm:$0xff] }
0x14cb   : > { %2338 = vmatpush3.bf16.msra.mxu1 %v2380_v18 }
0x1586   : > { %v1920_v35 = vpop.f32.mrf.mxu1 }
0x1587   : > { %v1921_v36 = vadd.f32 %v2147_v34, %v1920_v35 }
0x1588   : > { %v2333_v37 = vpop.f32.mrf.mxu1 }
0x1589   : > { %2411 = vtanh.f32 %v1921_v36 }
0x158a   : > { %v1923_v38 = vpop.f32.mrf.mxu1 }
0x158c   : > { %v2334_v25 = vpop.f32.mrf.mxu1 }
0x1596   : > { %v2412_v39 = vpop.eup %2411 }
0x1597   : > { %v1927_v40 = vpack.c.bf16 %v2412_v39, %v2412_v39 }
0x1599   : > { %2340 = vmatmul.mubr.msk.bf16.vlgmr.msra.gmra.mxu1 %vm643_vm0, %v1927_v40 }
0x1659   : > { %v1988_v41 = vpop.f32.mrf.mxu1 }
0x165a   : > { %v1989_v42 = vadd.f32 %v2151_v8, %v1988_v41 }
0x165b   : > { %v2341_v43 = vpop.f32.mrf.mxu1 }
0x165c   : > { %1994 = vst [vmem:[%s638_s30] sm:$0xff] %v1989_v42 }
0x165d   : > { %v1991_v44 = vpop.f32.mrf.mxu1 }
0x165f   : > { %v2342_v45 = vpop.f32.mrf.mxu1 }
0x1660 PF: > { %s30_s1 = sadd.s32 1, %s2419_s1  }
0x1661   : > { %p27_p4 = scmp.ge.s32.totalorder %s30_s1, 4  }
0x1663   :  { %29 = sbr.rel (!%p27_p4) target bundleno = 6 (0x6), region = 145 }

</bundles_post_ra>
